<compile_context>
chip_gen: v6e
topology: v6e:2x2x1
jax: 0.10.0
libtpu: 0.0.40
codegen_flags: <defaults>
</compile_context>

<pallas_src>
import jax
import jax.numpy as jnp
from jax.experimental import pallas as pl
from jax.experimental.pallas import tpu as pltpu

KS = (3, 4, 5)        # conv kernel heights, as in the PyTorch module
FC_OUT = 100          # Linear output size, fixed in the PyTorch module
FC_PAD = 128          # lane-dense padded FC output width (sliced back to 100)
CO_LANE = 128         # per-branch channel padding (one full lane group)


def cnn_text_kernel(x_ref, w3_ref, w4_ref, w5_ref, bconv_ref, fcw_ref, fcb_ref,
                    out_ref):
    Bt, L, D = x_ref.shape
    Co_pad = w3_ref.shape[1]

    # f32 tile arrives via the BlockSpec pipeline; cast to bf16 on the VPU here
    # (no separate wrapper-side cast pass over HBM).
    xb = x_ref[...].astype(jnp.bfloat16)

    w_refs = {3: w3_ref, 4: w4_ref, 5: w5_ref}
    pooled = []                                   # list of (Bt, Co_pad)
    for K in KS:                                  # static Python unroll
        T = L - K + 1                             # valid conv output length
        # im2col: fold the K taps into the MXU contraction (depth K*D).
        win = jnp.concatenate([xb[:, k:k + T, :] for k in range(K)], axis=-1)
        conv = jnp.dot(win.reshape(Bt * T, K * D), w_refs[K][...],
                       preferred_element_type=jnp.float32)
        conv = conv.reshape(Bt, T, Co_pad)
        # Pool immediately so only one (Bt, T, Co_pad) f32 slab is live at once.
        pooled.append(jnp.max(conv, axis=1))      # (Bt, Co_pad)

    # Bias + ReLU hoisted past the time max-pool (mathematically identical).
    feat = jnp.concatenate(pooled, axis=1)        # (Bt, 3*Co_pad), 128-aligned
    feat = jnp.maximum(feat + bconv_ref[...], 0.0)

    # Single FC matmul on bf16 operands, f32 accumulate, lane-dense (128) out.
    y = jnp.dot(feat.astype(jnp.bfloat16), fcw_ref[...],
                preferred_element_type=jnp.float32) + fcb_ref[...]
    out_ref[...] = jnp.tanh(y).astype(out_ref.dtype)


def pack_params(params, D, Co):
    """Pack PyTorch-layout params into lane-dense, MXU-friendly layouts."""
    Co_pad = CO_LANE * ((Co + CO_LANE - 1) // CO_LANE)

    conv_ws = []
    bconv = jnp.zeros((1, len(KS) * Co_pad), jnp.float32)
    for i, K in enumerate(KS):
        w = params[f'conv_w{K}']                             # (Co, K, D)
        wk = jnp.transpose(w.reshape(Co, K * D))             # (K*D, Co); row k*D+d = w[:,k,d]
        wk = jnp.zeros((K * D, Co_pad), jnp.float32).at[:, :Co].set(wk)
        conv_ws.append(wk.astype(jnp.bfloat16))
        bconv = bconv.at[0, i * Co_pad:i * Co_pad + Co].set(params[f'conv_b{K}'])

    # Linear(3*Co, 100): PyTorch stores (out, in); pre-transpose, scatter rows to
    # the padded per-branch layout, pad cols 100 -> 128.
    fcw_t = jnp.transpose(params['fc_w'])                    # (3*Co, 100)
    fcw = jnp.zeros((len(KS) * Co_pad, FC_PAD), jnp.float32)
    for i in range(len(KS)):
        fcw = fcw.at[i * Co_pad:i * Co_pad + Co, :FC_OUT].set(
            fcw_t[i * Co:(i + 1) * Co, :])
    fcw = fcw.astype(jnp.bfloat16)
    fcb = jnp.zeros((1, FC_PAD), jnp.float32).at[0, :FC_OUT].set(params['fc_b'])
    return conv_ws, bconv, fcw, fcb, Co_pad


def _vmem_limit_bytes(b_tile, L, D, Co_pad):
    """Rough per-step VMEM need (with headroom) so the compiler allows the tile."""
    f32, bf16 = 4, 2
    est = (2 * b_tile * L * D * f32                 # double-buffered f32 x tile
           + b_tile * L * D * bf16                  # in-kernel bf16 copy of tile
           + b_tile * L * max(KS) * D * bf16        # largest im2col window
           + b_tile * L * Co_pad * f32              # largest per-branch conv out
           + b_tile * len(KS) * Co_pad * f32        # pooled features
           + 2 * b_tile * FC_PAD * f32              # double-buffered output tile
           + sum(K * D * Co_pad for K in KS) * bf16 # packed conv weights
           + len(KS) * Co_pad * FC_PAD * bf16       # FC weight
           + (len(KS) * Co_pad + FC_PAD) * f32)     # biases
    # 2x headroom, clamp to [32 MiB, 64 MiB] (v7x physical VMEM is 64 MiB).
    return int(min(max(2 * est, 32 << 20), 64 << 20))


def cnn_text_forward(x, params, *, b_tile=128):
    B, L, D = x.shape
    Co = params['conv_b3'].shape[0]
    assert L >= max(KS), f"seq_len={L} shorter than the largest conv kernel {max(KS)}"
    b_tile = min(b_tile, B)
    assert B % b_tile == 0, "batch must be divisible by the batch tile"

    conv_ws, bconv, fcw, fcb, Co_pad = pack_params(params, D, Co)
    w3, w4, w5 = conv_ws

    out = pl.pallas_call(
        cnn_text_kernel,
        out_shape=jax.ShapeDtypeStruct((B, FC_PAD), jnp.float32),
        grid_spec=pltpu.PrefetchScalarGridSpec(
            num_scalar_prefetch=0,
            grid=(B // b_tile,),
            in_specs=[
                pl.BlockSpec((b_tile, L, D), lambda i: (i, 0, 0)),      # x tile (f32)
                pl.BlockSpec((3 * D, Co_pad), lambda i: (0, 0)),        # conv W, K=3
                pl.BlockSpec((4 * D, Co_pad), lambda i: (0, 0)),        # conv W, K=4
                pl.BlockSpec((5 * D, Co_pad), lambda i: (0, 0)),        # conv W, K=5
                pl.BlockSpec((1, 3 * Co_pad), lambda i: (0, 0)),        # conv biases
                pl.BlockSpec((3 * Co_pad, FC_PAD), lambda i: (0, 0)),   # FC weight
                pl.BlockSpec((1, FC_PAD), lambda i: (0, 0)),            # FC bias
            ],
            out_specs=pl.BlockSpec((b_tile, FC_PAD), lambda i: (i, 0)),
        ),
        compiler_params=pltpu.CompilerParams(
            dimension_semantics=("parallel",),
            vmem_limit_bytes=_vmem_limit_bytes(b_tile, L, D, Co_pad)),
    )(x.astype(jnp.float32), w3, w4, w5, bconv, fcw, fcb)
    return out[:, :FC_OUT]                        # drop the 100->128 lane padding


def cnn_text_reference(x, params):
    """Pure-JAX reference mirroring the PyTorch forward (with bf16 operands)."""
    B, L, D = x.shape
    xb = x.astype(jnp.bfloat16).astype(jnp.float32)
    pooled = []
    for K in KS:
        w = params[f'conv_w{K}'].astype(jnp.bfloat16).astype(jnp.float32)  # (Co,K,D)
        b = params[f'conv_b{K}']
        T = L - K + 1
        acc = 0.0
        for k in range(K):
            acc = acc + jnp.einsum('btd,cd->btc', xb[:, k:k + T, :], w[:, k, :])
        acc = jax.nn.relu(acc + b[None, None, :])          # ReLU before pool (PyTorch order)
        pooled.append(jnp.max(acc, axis=1))
    feat = jnp.concatenate(pooled, axis=1)                 # (B, 3*Co)
    featb = feat.astype(jnp.bfloat16).astype(jnp.float32)
    fw = params['fc_w'].astype(jnp.bfloat16).astype(jnp.float32)   # (100, 3*Co)
    return jnp.tanh(featb @ fw.T + params['fc_b'][None, :])


if __name__ == "__main__":
    # Small shapes consistent with the module: batch=64, seq_len=16,
    # input_dim=32, n_filters=8 -> output (64, 100).  b_tile=8 gives 8 grid
    # steps so the batch pipeline (and v7x's two TensorCores) is exercised.
    B, L, D, Co = 64, 16, 32, 8

    key = jax.random.PRNGKey(0)
    ks = jax.random.split(key, 9)
    x = jax.random.normal(ks[0], (B, L, D), jnp.float32)

    def init_w(k, shape, fan_in):
        return jax.random.normal(k, shape, jnp.float32) / jnp.sqrt(fan_in)

    # Conv2d(1, Co, (K, D)) weights kept in PyTorch layout (Co, K, D); biases (Co,).
    params = {
        'conv_w3': init_w(ks[1], (Co, 3, D), 3 * D),
        'conv_b3': init_w(ks[2], (Co,), 3 * D),
        'conv_w4': init_w(ks[3], (Co, 4, D), 4 * D),
        'conv_b4': init_w(ks[4], (Co,), 4 * D),
        'conv_w5': init_w(ks[5], (Co, 5, D), 5 * D),
        'conv_b5': init_w(ks[6], (Co,), 5 * D),
        # Linear(3*Co, 100) in PyTorch layout: weight (100, 3*Co), bias (100,).
        'fc_w': init_w(ks[7], (FC_OUT, 3 * Co), 3 * Co),
        'fc_b': init_w(ks[8], (FC_OUT,), 3 * Co),
    }

    out = cnn_text_forward(x, params, b_tile=8)
    jax.block_until_ready(out)
    assert out.shape == (B, FC_OUT), out.shape

    ref = cnn_text_reference(x, params)
    # bf16 matmul operands (f32 accumulation) -> allow small numeric slack.
    assert jnp.allclose(out, ref, atol=2e-3, rtol=2e-3), \
        float(jnp.max(jnp.abs(out - ref)))

    print("KERNEL_OK")
</pallas_src>

<mosaic_0001>
module attributes {stable_mosaic.version = 11 : i64} {
  func.func @cnn_text_kernel(%arg0: i32, %arg1: memref<8x16x32xf32, #tpu.memory_space<vmem>>, %arg2: memref<96x128xbf16, #tpu.memory_space<vmem>>, %arg3: memref<128x128xbf16, #tpu.memory_space<vmem>>, %arg4: memref<160x128xbf16, #tpu.memory_space<vmem>>, %arg5: memref<1x384xf32, #tpu.memory_space<vmem>>, %arg6: memref<384x128xbf16, #tpu.memory_space<vmem>>, %arg7: memref<1x128xf32, #tpu.memory_space<vmem>>, %arg8: memref<8x128xf32, #tpu.memory_space<vmem>>) attributes {dimension_semantics = [#tpu.dimension_semantics<parallel>], iteration_bounds = array<i64: 8>, scalar_prefetch = 0 : i64, scratch_operands = 0 : i64, tpu.core_type = #tpu.core_type<tc>, window_params = [{transform_indices = @transform_0, window_bounds = array<i64: 8, 16, 32>}, {pipeline_mode = #tpu.pipeline_mode<synchronous>, transform_indices = @transform_1, window_bounds = array<i64: 96, 128>}, {pipeline_mode = #tpu.pipeline_mode<synchronous>, transform_indices = @transform_2, window_bounds = array<i64: 128, 128>}, {pipeline_mode = #tpu.pipeline_mode<synchronous>, transform_indices = @transform_3, window_bounds = array<i64: 160, 128>}, {pipeline_mode = #tpu.pipeline_mode<synchronous>, transform_indices = @transform_4, window_bounds = array<i64: 1, 384>}, {pipeline_mode = #tpu.pipeline_mode<synchronous>, transform_indices = @transform_5, window_bounds = array<i64: 384, 128>}, {pipeline_mode = #tpu.pipeline_mode<synchronous>, transform_indices = @transform_6, window_bounds = array<i64: 1, 128>}, {transform_indices = @transform_7, window_bounds = array<i64: 8, 128>}]} {
    %c0 = arith.constant 0 : index
    %c0_0 = arith.constant 0 : index
    %c0_1 = arith.constant 0 : index
    %0 = vector.load %arg1[%c0, %c0_0, %c0_1] : memref<8x16x32xf32, #tpu.memory_space<vmem>>, vector<8x16x32xf32>
    %1 = arith.truncf %0 : vector<8x16x32xf32> to vector<8x16x32xbf16>
    %2 = vector.extract_strided_slice %1 {offsets = [0, 0, 0], sizes = [8, 14, 32], strides = [1, 1, 1]} : vector<8x16x32xbf16> to vector<8x14x32xbf16>
    %3 = vector.extract_strided_slice %1 {offsets = [0, 1, 0], sizes = [8, 14, 32], strides = [1, 1, 1]} : vector<8x16x32xbf16> to vector<8x14x32xbf16>
    %4 = vector.extract_strided_slice %1 {offsets = [0, 2, 0], sizes = [8, 14, 32], strides = [1, 1, 1]} : vector<8x16x32xbf16> to vector<8x14x32xbf16>
    %5 = tpu.concatenate %2, %3, %4 in 2 : vector<8x14x32xbf16>, vector<8x14x32xbf16>, vector<8x14x32xbf16> -> vector<8x14x96xbf16>
    %6 = vector.shape_cast %5 : vector<8x14x96xbf16> to vector<112x96xbf16>
    %c0_2 = arith.constant 0 : index
    %c0_3 = arith.constant 0 : index
    %7 = vector.load %arg2[%c0_2, %c0_3] : memref<96x128xbf16, #tpu.memory_space<vmem>>, vector<96x128xbf16>
    %cst = arith.constant dense<0.000000e+00> : vector<112x128xf32>
    %8 = tpu.matmul %6, %7, %cst {dimension_numbers = #tpu.dot_dimension_numbers<[1], [0], [0], [1], [0, 0, 1, 1], [], []>} : vector<112x96xbf16>, vector<96x128xbf16>, vector<112x128xf32> -> vector<112x128xf32>
    %9 = vector.shape_cast %8 : vector<112x128xf32> to vector<8x14x128xf32>
    %cst_4 = arith.constant dense<0xFF800000> : vector<8x128xf32>
    %10 = vector.multi_reduction <maximumf>, %9, %cst_4 [1] : vector<8x14x128xf32> to vector<8x128xf32>
    %11 = vector.extract_strided_slice %1 {offsets = [0, 0, 0], sizes = [8, 13, 32], strides = [1, 1, 1]} : vector<8x16x32xbf16> to vector<8x13x32xbf16>
    %12 = vector.extract_strided_slice %1 {offsets = [0, 1, 0], sizes = [8, 13, 32], strides = [1, 1, 1]} : vector<8x16x32xbf16> to vector<8x13x32xbf16>
    %13 = vector.extract_strided_slice %1 {offsets = [0, 2, 0], sizes = [8, 13, 32], strides = [1, 1, 1]} : vector<8x16x32xbf16> to vector<8x13x32xbf16>
    %14 = vector.extract_strided_slice %1 {offsets = [0, 3, 0], sizes = [8, 13, 32], strides = [1, 1, 1]} : vector<8x16x32xbf16> to vector<8x13x32xbf16>
    %15 = tpu.concatenate %11, %12, %13, %14 in 2 : vector<8x13x32xbf16>, vector<8x13x32xbf16>, vector<8x13x32xbf16>, vector<8x13x32xbf16> -> vector<8x13x128xbf16>
    %16 = vector.shape_cast %15 : vector<8x13x128xbf16> to vector<104x128xbf16>
    %c0_5 = arith.constant 0 : index
    %c0_6 = arith.constant 0 : index
    %17 = vector.load %arg3[%c0_5, %c0_6] : memref<128x128xbf16, #tpu.memory_space<vmem>>, vector<128x128xbf16>
    %cst_7 = arith.constant dense<0.000000e+00> : vector<104x128xf32>
    %18 = tpu.matmul %16, %17, %cst_7 {dimension_numbers = #tpu.dot_dimension_numbers<[1], [0], [0], [1], [0, 0, 1, 1], [], []>} : vector<104x128xbf16>, vector<128x128xbf16>, vector<104x128xf32> -> vector<104x128xf32>
    %19 = vector.shape_cast %18 : vector<104x128xf32> to vector<8x13x128xf32>
    %cst_8 = arith.constant dense<0xFF800000> : vector<8x128xf32>
    %20 = vector.multi_reduction <maximumf>, %19, %cst_8 [1] : vector<8x13x128xf32> to vector<8x128xf32>
    %21 = vector.extract_strided_slice %1 {offsets = [0, 0, 0], sizes = [8, 12, 32], strides = [1, 1, 1]} : vector<8x16x32xbf16> to vector<8x12x32xbf16>
    %22 = vector.extract_strided_slice %1 {offsets = [0, 1, 0], sizes = [8, 12, 32], strides = [1, 1, 1]} : vector<8x16x32xbf16> to vector<8x12x32xbf16>
    %23 = vector.extract_strided_slice %1 {offsets = [0, 2, 0], sizes = [8, 12, 32], strides = [1, 1, 1]} : vector<8x16x32xbf16> to vector<8x12x32xbf16>
    %24 = vector.extract_strided_slice %1 {offsets = [0, 3, 0], sizes = [8, 12, 32], strides = [1, 1, 1]} : vector<8x16x32xbf16> to vector<8x12x32xbf16>
    %25 = vector.extract_strided_slice %1 {offsets = [0, 4, 0], sizes = [8, 12, 32], strides = [1, 1, 1]} : vector<8x16x32xbf16> to vector<8x12x32xbf16>
    %26 = tpu.concatenate %21, %22, %23, %24, %25 in 2 : vector<8x12x32xbf16>, vector<8x12x32xbf16>, vector<8x12x32xbf16>, vector<8x12x32xbf16>, vector<8x12x32xbf16> -> vector<8x12x160xbf16>
    %27 = vector.shape_cast %26 : vector<8x12x160xbf16> to vector<96x160xbf16>
    %c0_9 = arith.constant 0 : index
    %c0_10 = arith.constant 0 : index
    %28 = vector.load %arg4[%c0_9, %c0_10] : memref<160x128xbf16, #tpu.memory_space<vmem>>, vector<160x128xbf16>
    %cst_11 = arith.constant dense<0.000000e+00> : vector<96x128xf32>
    %29 = tpu.matmul %27, %28, %cst_11 {dimension_numbers = #tpu.dot_dimension_numbers<[1], [0], [0], [1], [0, 0, 1, 1], [], []>} : vector<96x160xbf16>, vector<160x128xbf16>, vector<96x128xf32> -> vector<96x128xf32>
    %30 = vector.shape_cast %29 : vector<96x128xf32> to vector<8x12x128xf32>
    %cst_12 = arith.constant dense<0xFF800000> : vector<8x128xf32>
    %31 = vector.multi_reduction <maximumf>, %30, %cst_12 [1] : vector<8x12x128xf32> to vector<8x128xf32>
    %32 = tpu.concatenate %10, %20, %31 in 1 : vector<8x128xf32>, vector<8x128xf32>, vector<8x128xf32> -> vector<8x384xf32>
    %c0_13 = arith.constant 0 : index
    %c0_14 = arith.constant 0 : index
    %33 = vector.load %arg5[%c0_13, %c0_14] : memref<1x384xf32, #tpu.memory_space<vmem>>, vector<1x384xf32>
    %34 = vector.broadcast %33 : vector<1x384xf32> to vector<8x384xf32>
    %35 = arith.addf %32, %34 : vector<8x384xf32>
    %cst_15 = arith.constant 0.000000e+00 : f32
    %36 = vector.broadcast %cst_15 : f32 to vector<8x384xf32>
    %37 = arith.maximumf %35, %36 : vector<8x384xf32>
    %38 = arith.truncf %37 : vector<8x384xf32> to vector<8x384xbf16>
    %c0_16 = arith.constant 0 : index
    %c0_17 = arith.constant 0 : index
    %39 = vector.load %arg6[%c0_16, %c0_17] : memref<384x128xbf16, #tpu.memory_space<vmem>>, vector<384x128xbf16>
    %cst_18 = arith.constant dense<0.000000e+00> : vector<8x128xf32>
    %40 = tpu.matmul %38, %39, %cst_18 {dimension_numbers = #tpu.dot_dimension_numbers<[1], [0], [0], [1], [0, 0, 1, 1], [], []>} : vector<8x384xbf16>, vector<384x128xbf16>, vector<8x128xf32> -> vector<8x128xf32>
    %c0_19 = arith.constant 0 : index
    %c0_20 = arith.constant 0 : index
    %41 = vector.load %arg7[%c0_19, %c0_20] : memref<1x128xf32, #tpu.memory_space<vmem>>, vector<1x128xf32>
    %42 = vector.broadcast %41 : vector<1x128xf32> to vector<8x128xf32>
    %43 = arith.addf %40, %42 : vector<8x128xf32>
    %44 = math.tanh %43 : vector<8x128xf32>
    %c0_21 = arith.constant 0 : index
    %c0_22 = arith.constant 0 : index
    %45 = vector.load %arg8[%c0_21, %c0_22] : memref<8x128xf32, #tpu.memory_space<vmem>>, vector<8x128xf32>
    tpu.vector_store %arg8[%c0_21, %c0_22], %44 {strides = array<i32>} : memref<8x128xf32, #tpu.memory_space<vmem>>, vector<8x128xf32>,
    return
  }
  func.func @transform_0(%arg0: i32) -> (i32, i32, i32) {
    %c0_i32 = arith.constant 0 : i32
    %c0_i32_0 = arith.constant 0 : i32
    %c0_i32_1 = arith.constant 0 : i32
    return %arg0, %c0_i32, %c0_i32_0 : i32, i32, i32
  }
  func.func @transform_1(%arg0: i32) -> (i32, i32) {
    %c0_i32 = arith.constant 0 : i32
    %c0_i32_0 = arith.constant 0 : i32
    %c0_i32_1 = arith.constant 0 : i32
    return %c0_i32, %c0_i32_0 : i32, i32
  }
  func.func @transform_2(%arg0: i32) -> (i32, i32) {
    %c0_i32 = arith.constant 0 : i32
    %c0_i32_0 = arith.constant 0 : i32
    %c0_i32_1 = arith.constant 0 : i32
    return %c0_i32, %c0_i32_0 : i32, i32
  }
  func.func @transform_3(%arg0: i32) -> (i32, i32) {
    %c0_i32 = arith.constant 0 : i32
    %c0_i32_0 = arith.constant 0 : i32
    %c0_i32_1 = arith.constant 0 : i32
    return %c0_i32, %c0_i32_0 : i32, i32
  }
  func.func @transform_4(%arg0: i32) -> (i32, i32) {
    %c0_i32 = arith.constant 0 : i32
    %c0_i32_0 = arith.constant 0 : i32
    %c0_i32_1 = arith.constant 0 : i32
    return %c0_i32, %c0_i32_0 : i32, i32
  }
  func.func @transform_5(%arg0: i32) -> (i32, i32) {
    %c0_i32 = arith.constant 0 : i32
    %c0_i32_0 = arith.constant 0 : i32
    %c0_i32_1 = arith.constant 0 : i32
    return %c0_i32, %c0_i32_0 : i32, i32
  }
  func.func @transform_6(%arg0: i32) -> (i32, i32) {
    %c0_i32 = arith.constant 0 : i32
    %c0_i32_0 = arith.constant 0 : i32
    %c0_i32_1 = arith.constant 0 : i32
    return %c0_i32, %c0_i32_0 : i32, i32
  }
  func.func @transform_7(%arg0: i32) -> (i32, i32) {
    %c0_i32 = arith.constant 0 : i32
    %c0_i32_0 = arith.constant 0 : i32
    return %arg0, %c0_i32 : i32, i32
  }
}

</mosaic_0001>

<bundles_post_ra>
// kernel: tpu_custom_call.1
= control target key start
LH: loop header
LB: loop body
LE: loop exit
PB: predicated region body
PF: predicated region fallthrough
CT: control target
= control target key end

     0   :  { %12 = vsyncpa [#allocation3], 0  ;;  %s7550_s0 = inlined_call_operand.vmem [shape: f32[64,16,32], index: 0, kind: input, shape index: {}]   ;;  %s7551_s1 = inlined_call_operand.vmem [shape: bf16[96,128], index: 1, kind: input, shape index: {}]   ;;  %s7552_s2 = inlined_call_operand.vmem [shape: bf16[128,128], index: 2, kind: input, shape index: {}]   ;;  %s7553_s3 = inlined_call_operand.vmem [shape: bf16[160,128], index: 3, kind: input, shape index: {}]   ;;  %s7554_s4 = inlined_call_operand.vmem [shape: f32[1,384], index: 4, kind: input, shape index: {}]   ;;  %s7555_s5 = inlined_call_operand.vmem [shape: bf16[384,128], index: 5, kind: input, shape index: {}]   ;;  %s7556_s6 = inlined_call_operand.vmem [shape: f32[1,128], index: 6, kind: input, shape index: {}]   ;;  %s7557_s7 = inlined_call_operand.hbm [shape: f32[64,128], index: 7, kind: output, shape index: {}]  }
   0x1   :  { %14 = vsyncpa [#allocation3 + $0x1], 0  ;;  %s5925_s24 = smov 0   ;;  %s5927_s25 = smov 0  }
   0x2   :  { %s5929_s26 = smov 0   ;;  %s5931_s27 = smov 0  }
   0x3 LB: > { %s5946_s28 = sadd.s32 4294967295, %s5874_s27   ;;  %s5433_s29 = sadd.s32 4294967294, %s5874_s27   ;;  %s5874_s27 = sphi %s5931_s27, %s7648_s27   ;;  %s5870_s26 = sphi %s5929_s26, %s7647_s26   ;;  %s5866_s25 = sphi %s5927_s25, %s7646_s25   ;;  %s5862_s24 = sphi %s5925_s24, %s7645_s24  }
   0x4   : > { %s5950_s30 = sadd.s32 1, %s5874_s27   ;;  %s179_s8 = sadd.s32 1, %s5870_s26 }
   0x5   : > { %s176_s9 = ssub.s32 %s5874_s27, %s5950_s30  ;;  %p189_p0 = scmp.ne.s32.totalorder %s5870_s26, %s5866_s25 }
   0x6   : > { %p177_p1 = scmp.eq.s32.totalorder %s176_s9, 0  ;;  %p190_p2 = scmp.eq.s32.totalorder %s5946_s28, 7 }
   0x7   : > { %p195_p3 = scmp.ne.s32.totalorder %s5866_s25, %s5862_s24  ;;  %p196_p4 = scmp.eq.s32.totalorder %s5433_s29, 7 }
   0x8   : > { %s5961_s10 = scalar_select %p177_p1, %s5870_s26, %s179_s8  }
   0x9   : > { %p5963_p5 = por %p190_p2, %p189_p0  ;;  %p5967_p6 = por %p196_p4, %p195_p3 }
   0xa   : > { %p5436_p7 = scmp.ge.s32.totalorder %s5874_s27, 1  ;;  %p242_p8 = scmp.lt.s32.totalorder %s5874_s27, 9 }
   0xc   : > { %p243_p9 = pnand %p5436_p7, %p242_p8 }
   0xe   : > { %246 = sbr.rel (%p243_p9) target bundleno = 825 (0x339), region = 48 }
  0x13   : > { %s5438_s13 = sshll.u32 %s5946_s28, 3  ;;  %v5764_v0 = vld [vmem:[%s7552_s2 + $0x38] sm:$0xff]   ;;  %v7562_v1 = vmov 0.0   ;;  %v5765_v2 = vld [vmem:[%s7551_s1 + $0x28] sm:$0xff]   ;;  %v5766_v3 = vld [vmem:[%s7552_s2 + $0x30] sm:$0xff]   ;;  %s5877_s9 = smov 64  }
  0x14   : > { %p276_p10 = scmp.lt.s32.totalorder %s5438_s13, 63  ;;  %5653 = vmatprep.subr.bf16.mxu1 %v7562_v1  ;;  %5613 = vmatprep.subr.bf16.mxu0 %v7562_v1  ;;  %v5767_v4 = vld [vmem:[%s7551_s1 + $0x20] sm:$0xff]   ;;  %v5768_v29 = vld [vmem:[%s7552_s2 + $0x28] sm:$0xff]   ;;  %v5769_v30 = vld [vmem:[%s7551_s1 + $0x18] sm:$0xff]   ;;  %s5878_s17 = smov 32   ;;  %vm5880_vm0 = vmmov 0  }
  0x15   : > { %5654 = vmatpush3.bf16.msra.mxu1 %v5764_v0  ;;  %5614 = vmatpush3.bf16.msra.mxu0 %v5765_v2  ;;  %v5770_v44 = vld [vmem:[%s7552_s2 + $0x20] sm:$0xff]   ;;  %v5771_v50 = vld [vmem:[%s7551_s1 + $0x10] sm:$0xff]   ;;  %vm411_vm1 = vcmask 261120   ;;  %vm428_vm2 = vcmask 523264   ;;  %vm1228_vm3 = vcmask 785408   ;;  %vm1871_vm4 = vcmask 1045504  }
  0x16   : > { %s7650_s13 = smov (!%p276_p10, %s5438_s13), 63  ;;  %5655 = vmatprep.subr.bf16.mxu1 %v7562_v1  ;;  %5615 = vmatprep.subr.bf16.mxu0 %v7562_v1  ;;  %vm4387_vm5 = vcmask 1044480   ;;  %vm5006_vm6 = vcmask 1041409   ;;  %vm4933_vm7 = vcmask 1043456   ;;  %vm5008_vm8 = vcmask 1042434   ;;  %s272_s23 = sand.u32 1, %s5866_s25  }
  0x17   : > { %s5553_s22 = sshll.u32 %s7650_s13, 4  ;;  %5625 = vmatprep.mubr.msk.bf16.mxu0 %vm5880_vm0, %v7562_v1  ;;  %5669 = vmatprep.mubr.msk.bf16.mxu1 %vm5880_vm0, %v7562_v1  ;;  %vm5010_vm9 = vcmask 1043459   ;;  %vm5012_vm10 = vcmask 1044484   ;;  %vm5014_vm11 = vcmask 1045509   ;;  %vm5016_vm12 = vcmask 1046534   ;;  %s5437_s29 = sshll.u32 %s272_s23, 3 }
  0x18   : > { %s5993_s8 = scalar_lea.vmem %s7550_s0, %s5553_s22  ;;  %s5879_s22 = smov 96   ;;  %vm5018_vm13 = vcmask 1047559  }
  0x19   : > { %5656 = vmatpush3.bf16.msra.mxu1 %v5766_v3  ;;  %v283_v5 = vld [vmem:[%s5993_s8] sm:$0xff]  ;;  %v284_v6 = vld [vmem:[%s5993_s8 + $0x8] sm:$0xff]  ;;  %v285_v7 = vld [vmem:[%s5993_s8 + $0x10] sm:$0xff]  ;;  %5616 = vmatpush3.bf16.msra.mxu0 %v5767_v4  ;;  %s274_s13 = scalar_lea.vmem [#allocation2], %s5437_s29  ;;  %s5361_s19 = scalar_lea.sflag [#allocation3], %s272_s23 }
  0x1a   : > { %5657 = vmatprep.subr.bf16.mxu1 %v7562_v1  ;;  %v5999_v8 = vpack.c.bf16 %v284_v6, %v283_v5  ;;  %v286_v9 = vld [vmem:[%s5993_s8 + $0x18] sm:$0xff]  ;;  %v287_v10 = vld [vmem:[%s5993_s8 + $0x20] sm:$0xff]  ;;  %v288_v11 = vld [vmem:[%s5993_s8 + $0x28] sm:$0xff]  ;;  %5617 = vmatprep.subr.bf16.mxu0 %v7562_v1  ;;  %s5374_s14 = sshll.u32 %s274_s13, 4  ;;  %s5375_s14 = int_to_ptr.vmem [resolvable:$true] %s5374_s14 }
  0x1b   : > { %v6004_v12 = vpack.c.bf16 %v286_v9, %v285_v7  ;;  %v6006_v13 = vpack.c.bf16 %v288_v11, %v287_v10  ;;  %v289_v14 = vld [vmem:[%s5993_s8 + $0x30] sm:$0xff]  ;;  %v290_v15 = vld [vmem:[%s5993_s8 + $0x38] sm:$0xff]  ;;  %v291_v24 = vld [vmem:[%s5993_s8 + $0x40] sm:$0xff]  ;;  %s5814_s20 = scalar_lea.vmem %s5375_s14, 128 }
  0x1c   : > { %v387_v16 = vrot.slane %v5999_v8, 1  ;;  %v308_v17 = vshrl.u32 %v5999_v8, 16  ;;  %v310_v18 = vshll.u32 %v5999_v8, 16  ;;  %v6018_v23 = vpack.c.bf16 %v290_v15, %v289_v14  ;;  %v292_v28 = vld [vmem:[%s5993_s8 + $0x48] sm:$0xff]  ;;  %v293_v32 = vld [vmem:[%s5993_s8 + $0x50] sm:$0xff]  ;;  %v294_v34 = vld [vmem:[%s5993_s8 + $0x58] sm:$0xff]  ;;  %p5815_p11 = scmp.ne.s32.totalorder %s5375_s14, %s5814_s20 }
  0x1d   : > { %7585 = vst [vmem:[#allocation5_spill] sm:$0xff] %v6004_v12  ;;  %7586 = vst [vmem:[#allocation6_spill] sm:$0xff] %v6006_v13  ;;  %v315_v19 = vshrl.u32 %v6004_v12, 16  ;;  %v317_v20 = vshll.u32 %v6004_v12, 16  ;;  %v324_v22 = vshll.u32 %v6006_v13, 16  ;;  %5658 = vmatpush3.bf16.msra.mxu1 %v5768_v29  ;;  %5618 = vmatpush3.bf16.msra.mxu0 %v5769_v30  ;;  %v388_v35 = vrot.slane %v6004_v12, 1 }
  0x1e   : > { %395 = vrot.lane.b32.xlu0 %v387_v16, %s5877_s9  ;;  %v312_v21 = vrot.slane %v310_v18, 1  ;;  %v1936_v26 = vrot.slane %v308_v17, 1  ;;  %v1937_v27 = vrot.slane %v310_v18, 2  ;;  %v322_v36 = vshrl.u32 %v6006_v13, 16  ;;  %5659 = vmatprep.subr.bf16.mxu1 %v7562_v1  ;;  %v295_v48 = vld [vmem:[%s5993_s8 + $0x60] sm:$0xff]  ;;  %v296_v49 = vld [vmem:[%s5993_s8 + $0x68] sm:$0xff]  ;;  %p5816_p12 = pnand %p5815_p11, %p5963_p5 }
  0x1f   : > { %v319_v25 = vrot.slane %v317_v20, 1  ;;  %v326_v37 = vrot.slane %v324_v22, 1  ;;  %v331_v38 = vshll.u32 %v6018_v23, 16  ;;  %v1939_v39 = vrot.slane %v315_v19, 1  ;;  %5619 = vmatprep.subr.bf16.mxu0 %v7562_v1  ;;  %v297_v59 = vld [vmem:[%s5993_s8 + $0x70] sm:$0xff]  ;;  %v298_v60 = vld [vmem:[%s5993_s8 + $0x78] sm:$0xff] }
  0x20   : > { %v313_v31 = vor.u32 %v312_v21, %v308_v17  ;;  %v1938_v40 = vor.u32 %v1937_v27, %v1936_v26  ;;  %v1940_v41 = vrot.slane %v317_v20, 2  ;;  %v6036_v42 = vpack.c.bf16 %v292_v28, %v291_v24  ;;  %v5772_v5 = vld [vmem:[%s7552_s2 + $0x18] sm:$0xff]   ;;  %v5773_v11 = vld [vmem:[%s7551_s1 + $0x8] sm:$0xff]   ;;  %v5774_v26 = vld [vmem:[%s7552_s2 + $0x10] sm:$0xff]   ;;  %s5550_s8 = sshll.u32 %s5946_s28, 7  ;;  %p5817_p13 = pneg %p5816_p12 }
  0x21   : > { %v320_v33 = vor.u32 %v319_v25, %v315_v19  ;;  %v6039_v43 = vpack.c.bf16 %v294_v34, %v293_v32  ;;  %v327_v45 = vor.u32 %v326_v37, %v322_v36  ;;  %v329_v46 = vshrl.u32 %v6018_v23, 16  ;;  %5660 = vmatpush3.bf16.msra.mxu1 %v5770_v44  ;;  %5620 = vmatpush3.bf16.msra.mxu0 %v5771_v50  ;;  %v5775_v29 = vld [vmem:[%s7551_s1] sm:$0xff]   ;;  %s7515_s18 = scalar_lea.hbm %s7557_s7, %s5550_s8 }
  0x22   : > { %363 = vrot.lane.b32.xlu0 %v313_v31, %s5878_s17  ;;  %7587 = vst [vmem:[#allocation7_spill] sm:$0xff] %v6036_v42  ;;  %v333_v47 = vrot.slane %v331_v38, 1  ;;  %v1941_v51 = vor.u32 %v1940_v41, %v1939_v39  ;;  %v389_v52 = vrot.slane %v6006_v13, 1  ;;  %v1942_v53 = vrot.slane %v322_v36, 1  ;;  %5661 = vmatprep.subr.bf16.mxu1 %v7562_v1  ;;  %v5776_v41 = vld [vmem:[%s7552_s2 + $0x8] sm:$0xff]  }
  0x23   : > { %365 = vrot.lane.b32.xlu1 %v320_v33, %s5878_s17  ;;  %7588 = vst [vmem:[#allocation8_spill] sm:$0xff] %v6039_v43  ;;  %v338_v54 = vshll.u32 %v6036_v42, 16  ;;  %v1943_v55 = vrot.slane %v324_v22, 2  ;;  %v390_v56 = vrot.slane %v6018_v23, 1  ;;  %v1945_v57 = vrot.slane %v329_v46, 1  ;;  %5621 = vmatprep.subr.bf16.mxu0 %v7562_v1 }
  0x24   : > { %v345_v58 = vshll.u32 %v6039_v43, 16  ;;  %v1946_v61 = vrot.slane %v331_v38, 2  ;;  %v336_v62 = vshrl.u32 %v6036_v42, 16  ;;  %v6060_v63 = vpack.c.bf16 %v296_v49, %v295_v48 }
  0x25   : > { %v334_v0 = vor.u32 %v333_v47, %v329_v46  ;;  %v391_v2 = vrot.slane %v6036_v42, 1  ;;  %v343_v3 = vshrl.u32 %v6039_v43, 16  ;;  %v392_v4 = vrot.slane %v6039_v43, 1  ;;  %5662 = vmatpush3.bf16.msra.mxu1 %v5772_v5  ;;  %5622 = vmatpush3.bf16.msra.mxu0 %v5773_v11  ;;  %v5778_v46 = vld [vmem:[%s7552_s2] sm:$0xff]  }
  0x26   : > { %397 = vrot.lane.b32.xlu0 %v388_v35, %s5877_s9  ;;  %7589 = vst [vmem:[#allocation9_spill] sm:$0xff] %v6060_v63  ;;  %v340_v6 = vrot.slane %v338_v54, 1  ;;  %v1948_v7 = vrot.slane %v336_v62, 1  ;;  %v1949_v9 = vrot.slane %v338_v54, 2  ;;  %v350_v10 = vshrl.u32 %v6060_v63, 16  ;;  %5663 = vmatprep.subr.bf16.mxu1 %v7562_v1 }
  0x27   : > { %1960 = vrot.lane.b32.xlu1 %v1938_v40, %s5879_s22  ;;  %v347_v14 = vrot.slane %v345_v58, 1  ;;  %v1951_v15 = vrot.slane %v343_v3, 1  ;;  %v1952_v16 = vrot.slane %v345_v58, 2  ;;  %v352_v17 = vshll.u32 %v6060_v63, 16  ;;  %5623 = vmatprep.subr.bf16.mxu0 %v7562_v1 }
  0x28   : > { %v6076_v18 = vpack.c.bf16 %v298_v60, %v297_v59  ;;  %v1944_v19 = vor.u32 %v1943_v55, %v1942_v53  ;;  %v393_v20 = vrot.slane %v6060_v63, 1  ;;  %v341_v22 = vor.u32 %v340_v6, %v336_v62 }
  0x29   : > { %v1947_v24 = vor.u32 %v1946_v61, %v1945_v57  ;;  %v354_v25 = vrot.slane %v352_v17, 1  ;;  %v1950_v27 = vor.u32 %v1949_v9, %v1948_v7  ;;  %5664 = vmatpush3.bf16.msra.mxu1 %v5774_v26  ;;  %5624 = vmatpush3.bf16.msra.mxu0 %v5775_v29  ;;  %v1954_v30 = vrot.slane %v350_v10, 1 }
  0x2a   : > { %367 = vrot.lane.b32.xlu0 %v327_v45, %s5878_s17  ;;  %7590 = vst [vmem:[#allocation10_spill] sm:$0xff] %v6076_v18  ;;  %v357_v21 = vshrl.u32 %v6076_v18, 16  ;;  %v359_v28 = vshll.u32 %v6076_v18, 16  ;;  %5665 = vmatprep.subr.bf16.mxu1 %v7562_v1  ;;  %v1955_v32 = vrot.slane %v352_v17, 2  ;;  %v348_v33 = vor.u32 %v347_v14, %v343_v3 }
  0x2b   : > { %1962 = vrot.lane.b32.xlu1 %v1941_v51, %s5879_s22  ;;  %v355_v34 = vor.u32 %v354_v25, %v350_v10  ;;  %v1953_v35 = vor.u32 %v1952_v16, %v1951_v15  ;;  %v394_v37 = vrot.slane %v6076_v18, 1  ;;  %v7560_v44 = vmov 0  }
  0x2c   : > { %v361_v31 = vrot.slane %v359_v28, 1  ;;  %v1956_v38 = vor.u32 %v1955_v32, %v1954_v30  ;;  %v1957_v39 = vrot.slane %v357_v21, 1  ;;  %v1958_v40 = vrot.slane %v359_v28, 2  ;;  %4808 = vmatprep.subr.bf16.mxu0 %v7560_v44  ;;  %v5777_v44 = vld [vmem:[%s7553_s3 + $0x38] sm:$0xff]  }
  0x2d   : > { %5666 = vmatpush3.bf16.msra.mxu1 %v5776_v41  ;;  %v5882_v49 = vmov 1966171168   ;;  %v457_v51 = vlaneseq  ;;  %v5883_v59 = vmov 1983009808   ;;  %v4452_v5 = vrot.slane %v5999_v8, 2 }
  0x2e   : > { %369 = vrot.lane.b32.xlu0 %v334_v0, %s5878_s17  ;;  %v362_v36 = vor.u32 %v361_v31, %v357_v21  ;;  %v1959_v45 = vor.u32 %v1958_v40, %v1957_v39  ;;  %5667 = vmatprep.subr.bf16.mxu1 %v7562_v1  ;;  %v455_v50 = vunpack.c.l.s4 %v5882_v49  ;;  %v1355_v60 = vunpack.c.l.s4 %v5883_v59 }
  0x2f   : > { %399 = vrot.lane.b32.xlu1 %v389_v52, %s5877_s9  ;;  %v6120_v54 = vshrl.u32 %v457_v51, 7  ;;  %v7558_v6 = vrot.slane %v6004_v12, 2  ;;  %v7559_v39 = vrot.slane %v6006_v13, 2 }
  0x30   : > { %v456_v53 = vunpack.c.0.s8 %v455_v50 }
  0x31   : > { %5668 = vmatpush3.bf16.msra.mxu1 %v5778_v46  ;;  %7591 = vst [vmem:[#allocation11_spill] sm:$0xff] %v6120_v54 }
  0x32   : > { %401 = vrot.lane.b32.xlu0 %v390_v56, %s5877_s9  ;;  %v6125_v57 = vsub.s32 %v456_v53, %v6120_v54 }
  0x33   : > { %1964 = vrot.lane.b32.xlu1 %v1944_v19, %s5879_s22 }
  0x36   : > { %371 = vrot.lane.b32.xlu0 %v341_v22, %s5878_s17 }
  0x37   : > { %1966 = vrot.lane.b32.xlu1 %v1947_v24, %s5879_s22 }
  0x3a   : > { %1968 = vrot.lane.b32.xlu0 %v1950_v27, %s5879_s22 }
  0x3b   : > { %403 = vrot.lane.b32.xlu1 %v391_v2, %s5877_s9 }
  0x3e   : > { %405 = vrot.lane.b32.xlu0 %v392_v4, %s5877_s9  ;;  %v1356_v4 = vunpack.c.0.s8 %v1355_v60 }
  0x3f   : > { %373 = vrot.lane.b32.xlu1 %v348_v33, %s5878_s17 }
  0x40   : > { %v6140_v15 = vsub.s32 %v1356_v4, %v6120_v54 }
  0x42   : > { %375 = vrot.lane.b32.xlu0 %v355_v34, %s5878_s17 }
  0x43   : > { %1970 = vrot.lane.b32.xlu1 %v1953_v35, %s5879_s22 }
  0x46   : > { %377 = vrot.lane.b32.xlu0 %v362_v36, %s5878_s17  ;;  %s5884_s17 = smov [#allocation2]  }
  0x47   : > { %407 = vrot.lane.b32.xlu1 %v393_v20, %s5877_s9  ;;  %s5818_s21 = sshll.u32 %s5884_s17, 4  ;;  %s5819_s21 = int_to_ptr.vmem [resolvable:$false] %s5818_s21 }
  0x48   : > { %s5820_s28 = scalar_lea.vmem %s5819_s21, 256  ;;  %p5821_p0 = scmp.lt.s32.totalorder %s5375_s14, %s5819_s21 }
  0x49   : > { %p5822_p1 = scmp.lt.s32.totalorder %s5820_s28, %s5814_s20 }
  0x4a   : > { %409 = vrot.lane.b32.xlu0 %v394_v37, %s5877_s9 }
  0x4b   : > { %1972 = vrot.lane.b32.xlu1 %v1956_v38, %s5879_s22  ;;  %p5823_p2 = por %p5822_p1, %p5821_p0 }
  0x4d   : > { %p5824_p3 = pnand %p5823_p2, %p5817_p13 }
  0x4f   : > { %1974 = vrot.lane.b32.xlu1 %v1959_v45, %s5879_s22 }
  0x90   : > { %v396_v47 = vpop.permute.xlu0 %395 }
  0x94   : > { %v364_v52 = vpop.permute.xlu0 %363 }
  0x95   : > { %v366_v48 = vpop.permute.xlu1 %365  ;;  %v413_v55 = vsel %vm411_vm1, %v5999_v8, %v364_v52 }
  0x96   : > { %v430_v58 = vsel %vm428_vm2, %v413_v55, %v396_v47  ;;  %v415_v3 = vsel %vm411_vm1, %v6004_v12, %v366_v48 }
  0x97   : > { %v453_v61 = vcombine.high %v430_v58, %v430_v58  ;;  %v460_v0 = vrot.slane %v430_v58, %v6125_v57 }
  0x98   : > { %v398_v62 = vpop.permute.xlu0 %397 }
  0x99   : > { %v1961_v56 = vpop.permute.xlu1 %1960  ;;  %v432_v9 = vsel %vm428_vm2, %v415_v3, %v398_v62  ;;  %v467_v10 = vrot.slane %v453_v61, %v6125_v57  ;;  %v468_v14 = vcombine.high %v460_v0, %v460_v0  ;;  %v476_v28 = vrot.slane %v460_v0, %v6125_v57 }
  0x9a   : > { %v1977_v7 = vsel %vm1228_vm3, %v430_v58, %v1961_v56  ;;  %v508_v19 = vrot.slane %v432_v9, %v6125_v57  ;;  %v501_v21 = vcombine.high %v432_v9, %v432_v9 }
  0x9b   : > { %v4461_v16 = vcombine.high %v1977_v7, %v4452_v5  ;;  %v2000_v17 = vcombine.high %v1977_v7, %v1977_v7  ;;  %v469_v20 = vcombine.high %v467_v10, %v467_v10  ;;  %v490_v24 = vrot.slane %v468_v14, %v6125_v57 }
  0x9c   : > { %v2007_v25 = vrot.slane %v1977_v7, %v6125_v57  ;;  %v4460_v26 = vcombine.low %v1977_v7, %v4452_v5  ;;  %v516_v30 = vcombine.high %v508_v19, %v508_v19  ;;  %v368_v32 = vpop.permute.xlu0 %367  ;;  %v515_v34 = vrot.slane %v501_v21, %v6125_v57 }
  0x9d   : > { %v1963_v2 = vpop.permute.xlu1 %1962  ;;  %v4475_v27 = vrot.slane %v4461_v16, %v6140_v15  ;;  %v2014_v29 = vrot.slane %v2000_v17, %v6125_v57  ;;  %v6157_v33 = vrot.slane %v469_v20, %v6125_v57  ;;  %v6164_v36 = vrot.slane %v467_v10, %v6125_v57 }
  0x9e   : > { %v6137_v11 = vsel %vm1228_vm3, %v432_v9, %v1963_v2  ;;  %v849_v37 = vcombine.low %v476_v28, %v490_v24  ;;  %v5441_v38 = vcombine.high %v476_v28, %v490_v24  ;;  %v2015_v40 = vcombine.high %v2007_v25, %v2007_v25 }
  0x9f   : > { %7592 = vst [vmem:[#allocation12_spill] sm:$0xff] %v6137_v11  ;;  %v4477_v8 = vcombine.low %v6137_v11, %v7558_v6  ;;  %v2048_v31 = vcombine.high %v6137_v11, %v6137_v11  ;;  %v4468_v41 = vrot.slane %v4460_v26, %v6140_v15  ;;  %v524_v45 = vrot.slane %v508_v19, %v6125_v57 }
  0xa0   : > { %v417_v46 = vsel %vm411_vm1, %v6006_v13, %v368_v32  ;;  %v2016_v48 = vcombine.high %v2014_v29, %v2014_v29  ;;  %v6172_v49 = vrot.slane %v2014_v29, %v6125_v57  ;;  %v538_v50 = vrot.slane %v516_v30, %v6125_v57  ;;  %v370_v62 = vpop.permute.xlu0 %369 }
  0xa1   : > { %v6147_v22 = vrot.slane %v4477_v8, %v6140_v15  ;;  %v400_v47 = vpop.permute.xlu1 %399  ;;  %v2062_v51 = vrot.slane %v2048_v31, %v6125_v57  ;;  %v851_v52 = vcombine.low %v6164_v36, %v6157_v33  ;;  %v6179_v53 = vrot.slane %v2007_v25, %v6125_v57 }
  0xa2   : > { %v517_v55 = vcombine.high %v515_v34, %v515_v34  ;;  %v2055_v56 = vrot.slane %v6137_v11, %v6125_v57  ;;  %v6184_v58 = vrot.slane %v849_v37, %v6125_v57  ;;  %v499_v59 = vcombine.high %v6164_v36, %v6164_v36 }
  0xa3   : > { %7593 = vst [vmem:[#allocation13_spill] sm:$0xff] %v6147_v22  ;;  %v6161_v35 = vcombine.low %v4475_v27, %v6147_v22  ;;  %v531_v60 = vrot.slane %v515_v34, %v6125_v57  ;;  %v434_v61 = vsel %vm428_vm2, %v417_v46, %v400_v47  ;;  %v6191_v0 = vrot.slane %v5441_v38, %v6125_v57 }
  0xa4   : > { %v6194_v2 = vrot.slane %v2015_v40, %v6125_v57  ;;  %v4476_v3 = vcombine.high %v4468_v41, %v4468_v41  ;;  %v546_v4 = vcombine.high %v524_v45, %v524_v45  ;;  %v6197_v5 = vrot.slane %v2016_v48, %v6125_v57  ;;  %v402_v37 = vpop.permute.xlu0 %401 }
  0xa5   : > { %v2046_v7 = vcombine.high %v6172_v49, %v6172_v49  ;;  %v548_v9 = vcombine.high %v538_v50, %v538_v50  ;;  %v2064_v10 = vcombine.high %v2062_v51, %v2062_v51  ;;  %v545_v14 = vrot.slane %v517_v55, %v6125_v57  ;;  %v1965_v19 = vpop.permute.xlu1 %1964 }
  0xa6   : > { %v2063_v16 = vcombine.high %v2055_v56, %v2055_v56  ;;  %v549_v8 = vcombine.high %v434_v61, %v434_v61  ;;  %v556_v17 = vrot.slane %v434_v61, %v6125_v57  ;;  %v547_v20 = vcombine.high %v531_v60, %v531_v60 }
  0xa7   : > { %v6203_v21 = vcombine.low %v499_v59, %v524_v45  ;;  %v6206_v24 = vrot.slane %v2055_v56, %v6125_v57  ;;  %v6209_v25 = vrot.slane %v2062_v51, %v6125_v57  ;;  %v6215_v28 = vcombine.low %v4468_v41, %v4476_v3 }
  0xa8   : > { %v6217_v29 = vcombine.low %v538_v50, %v546_v4  ;;  %v6219_v30 = vcombine.low %v548_v9, %v531_v60  ;;  %v2092_v31 = vrot.slane %v2064_v10, %v6125_v57  ;;  %v419_v32 = vsel %vm411_vm1, %v6018_v23, %v370_v62 }
  0xa9   : > { %v6225_v34 = vsel %vm1228_vm3, %v434_v61, %v1965_v19  ;;  %v6230_v40 = vrot.slane %v2063_v16, %v6125_v57  ;;  %v563_v41 = vrot.slane %v549_v8, %v6125_v57  ;;  %v564_v45 = vcombine.high %v556_v17, %v556_v17  ;;  %v1967_v4 = vpop.permute.xlu1 %1966 }
  0xaa   : > { %7594 = vst [vmem:[#allocation14_spill] sm:$0xff] %v6225_v34  ;;  %v880_v46 = vrot.slane %v6203_v21, %v6125_v57  ;;  %v6235_v47 = vcombine.low %v545_v14, %v547_v20  ;;  %v6239_v48 = vcombine.high %v6206_v24, %v6206_v24  ;;  %v2406_v50 = vunpack.i.h.s16 %v6209_v25 }
  0xab   : > { %v2096_v55 = vcombine.high %v6225_v34, %v6225_v34  ;;  %v2103_v56 = vrot.slane %v6225_v34, %v6125_v57  ;;  %v436_v59 = vsel %vm428_vm2, %v419_v32, %v402_v37  ;;  %v6253_v62 = vpack.i.b16 %v6206_v24, %v2046_v7 }
  0xac   : > { %v2408_v3 = vunpack.i.h.s16 %v2092_v31  ;;  %v6257_v9 = vcombine.high %v6230_v40, %v6230_v40  ;;  %v565_v14 = vcombine.high %v563_v41, %v563_v41  ;;  %v586_v16 = vrot.slane %v564_v45, %v6125_v57 }
  0xad   : > { %v6262_v19 = vpack.i.b16 %v2092_v31, %v2406_v50  ;;  %v2094_v20 = vcombine.high %v6209_v25, %v6209_v25  ;;  %v604_v7 = vrot.slane %v436_v59, %v6125_v57  ;;  %v572_v21 = vrot.slane %v556_v17, %v6125_v57  ;;  %v372_v50 = vpop.permute.xlu0 %371  ;;  %v404_v38 = vpop.permute.xlu1 %403 }
  0xae   : > { %v2110_v32 = vrot.slane %v2096_v55, %v6125_v57  ;;  %v2111_v37 = vcombine.high %v2103_v56, %v2103_v56  ;;  %v6270_v6 = vrot.slane %v2103_v56, %v6125_v57  ;;  %v6277_v31 = vcombine.low %v6225_v34, %v7559_v39 }
  0xaf   : > { %v6272_v10 = vpack.i.b16 %v2094_v20, %v2408_v3  ;;  %v597_v45 = vcombine.high %v436_v59, %v436_v59  ;;  %v873_v17 = vrot.slane %v851_v52, %v6125_v57  ;;  %v579_v55 = vrot.slane %v563_v41, %v6125_v57 }
  0xb0   : > { %v593_v8 = vrot.slane %v565_v14, %v6125_v57  ;;  %v901_v56 = vcombine.low %v572_v21, %v586_v16  ;;  %v5442_v51 = vcombine.high %v572_v21, %v586_v16  ;;  %v612_v3 = vcombine.high %v604_v7, %v604_v7 }
  0xb1   : > { %v620_v20 = vrot.slane %v604_v7, %v6125_v57  ;;  %v6287_v60 = vsel %vm1228_vm3, %v436_v59, %v1967_v4  ;;  %v421_v39 = vsel %vm411_vm1, %v6036_v42, %v372_v50  ;;  %v2112_v27 = vcombine.high %v2110_v32, %v2110_v32  ;;  %v1969_v26 = vpop.permute.xlu0 %1968  ;;  %v5784_v42 = vld [vmem:[%s7553_s3 + $0x8] sm:$0xff]  }
  0xb2   : > { %7595 = vst [vmem:[#allocation15_spill] sm:$0xff] %v6287_v60  ;;  %v6292_v33 = vrot.slane %v2110_v32, %v6125_v57  ;;  %v2133_v36 = vrot.slane %v2111_v37, %v6125_v57  ;;  %v2141_v52 = vcombine.high %v6270_v6, %v6270_v6  ;;  %v611_v14 = vrot.slane %v597_v45, %v6125_v57 }
  0xb3   : > { %v881_v59 = vcombine.low %v6184_v58, %v6191_v0  ;;  %v882_v4 = vcombine.low %v873_v17, %v880_v46  ;;  %v595_v16 = vcombine.high %v579_v55, %v579_v55  ;;  %v2144_v7 = vcombine.high %v6287_v60, %v6287_v60 }
  0xb4   : > { %v2151_v21 = vrot.slane %v6287_v60, %v6125_v57  ;;  %v438_v32 = vsel %vm428_vm2, %v421_v39, %v404_v38  ;;  %v634_v37 = vrot.slane %v612_v3, %v6125_v57  ;;  %v642_v50 = vcombine.high %v620_v20, %v620_v20 }
  0xb5   : > { %v889_v41 = vrot.slane %v881_v59, %v6125_v57  ;;  %v896_v45 = vrot.slane %v882_v4, %v6125_v57  ;;  %v929_v58 = vrot.slane %v901_v56, %v6125_v57  ;;  %v948_v0 = vcombine.low %v579_v55, %v593_v8 }
  0xb6   : > { %v6312_v46 = vrot.slane %v5442_v51, %v6125_v57  ;;  %v2143_v17 = vcombine.high %v2133_v36, %v2133_v36  ;;  %v6318_v39 = vrot.slane %v2112_v27, %v6125_v57  ;;  %v613_v38 = vcombine.high %v611_v14, %v611_v14 }
  0xb7   : > { %v897_v3 = vcombine.low %v889_v41, %v896_v45  ;;  %v645_v59 = vcombine.high %v438_v32, %v438_v32  ;;  %v627_v4 = vrot.slane %v611_v14, %v6125_v57  ;;  %v6321_v61 = vcombine.low %v595_v16, %v620_v20  ;;  %v5779_v16 = vld [vmem:[%s7553_s3 + $0x30] sm:$0xff]  }
  0xb8   : > { %v6324_v8 = vrot.slane %v2144_v7, %v6125_v57  ;;  %v6327_v51 = vsel %vm1228_vm3, %v438_v32, %v1969_v26  ;;  %v644_v56 = vcombine.high %v634_v37, %v634_v37  ;;  %v6331_v1 = vcombine.low %v634_v37, %v642_v50 }
  0xb9   : > { %7596 = vst [vmem:[#allocation16_spill] sm:$0xff] %v6327_v51  ;;  %v2159_v27 = vcombine.high %v2151_v21, %v2151_v21  ;;  %5626 = vmatmul.mubr.msk.bf16.vlgmr.msra.gmra.mxu0 %vm1228_vm3, %v897_v3  ;;  %v6335_v41 = vrot.slane %v948_v0, %v6125_v57  ;;  %v6337_v20 = vcombine.low %v2133_v36, %v2141_v52  ;;  %v374_v52 = vpop.permute.xlu1 %373  ;;  %v7597_v45 = vmov 0.0  }
  0xba   : > { %v6340_v14 = vcombine.low %v2143_v17, %v6292_v33  ;;  %v652_v26 = vrot.slane %v438_v32, %v6125_v57  ;;  %4809 = vmatpush1.bf16.msra.mxu0 %v5777_v44  ;;  %v641_v7 = vrot.slane %v613_v38, %v6125_v57  ;;  %v6348_v37 = vrot.slane %v2151_v21, %v6125_v57 }
  0xbb   : > { %v659_v50 = vrot.slane %v645_v59, %v6125_v57  ;;  %v2192_v36 = vcombine.high %v6327_v51, %v6327_v51  ;;  %5629 = vmatprep.mubr.msk.bf16.mxu0 %vm5880_vm0, %v7597_v45  ;;  %v643_v32 = vcombine.high %v627_v4, %v627_v4  ;;  %v2160_v0 = vcombine.high %v6324_v8, %v6324_v8 }
  0xbc   : > { %v7598_v17 = vunpack.i.h.s16 %v6206_v24  ;;  %v7599_v38 = vmov 0   ;;  %v6365_v59 = vcombine.low %v644_v56, %v627_v4  ;;  %v6369_v55 = vrot.slane %v6324_v8, %v6125_v57  ;;  %v5780_v4 = vld [vmem:[%s7553_s3 + $0x28] sm:$0xff]  }
  0xbd   : > { %4810 = vmatprep.subr.bf16.mxu0 %v7599_v38  ;;  %v6372_v44 = vrot.slane %v2159_v27, %v6125_v57  ;;  %v660_v54 = vcombine.high %v652_v26, %v652_v26  ;;  %v423_v24 = vsel %vm411_vm1, %v6039_v43, %v374_v52  ;;  %v7600_v34 = vcombine.low %v6179_v53, %v6194_v2  ;;  %v406_v43 = vpop.permute.xlu0 %405 }
  0xbe   : > { %v5459_v21 = vpack.i.b16 %v6230_v40, %v7598_v17  ;;  %4811 = vmatpush1.bf16.msra.mxu0 %v5779_v16  ;;  %v661_v8 = vcombine.high %v659_v50, %v659_v50  ;;  %v2199_v56 = vrot.slane %v6327_v51, %v6125_v57  ;;  %v2206_v27 = vrot.slane %v2192_v36, %v6125_v57 }
  0xbf   : > { %v2566_v3 = vrot.slane %v7600_v34, %v6125_v57  ;;  %4812 = vmatprep.subr.bf16.mxu0 %v7599_v38  ;;  %v7602_v34 = vcombine.low %v6172_v49, %v6197_v5  ;;  %v922_v51 = vrot.slane %v6235_v47, %v6125_v57  ;;  %v7603_v36 = vrot.slane %v6219_v30, %v6125_v57 }
  0xc0   : > { %v2559_v17 = vcombine.low %v6253_v62, %v5459_v21  ;;  %v7601_v62 = vcombine.high %v6179_v53, %v6194_v2  ;;  %v7604_v53 = vrot.slane %v6217_v29, %v6125_v57  ;;  %v6409_v13 = vcombine.high %v6348_v37, %v6348_v37  ;;  %v5781_v29 = vld [vmem:[%s7553_s3 + $0x20] sm:$0xff]  }
  0xc1   : > { %v2580_v16 = vrot.slane %v7602_v34, %v6125_v57  ;;  %v668_v49 = vrot.slane %v652_v26, %v6125_v57  ;;  %v682_v47 = vrot.slane %v660_v54, %v6125_v57  ;;  %v931_v30 = vcombine.low %v922_v51, %v929_v58 }
  0xc2   : > { %v2573_v52 = vrot.slane %v7601_v62, %v6125_v57  ;;  %v2587_v21 = vrot.slane %v2559_v17, %v6125_v57  ;;  %v930_v2 = vcombine.low %v7604_v53, %v7603_v36  ;;  %v6405_v62 = vcombine.low %v641_v7, %v643_v32  ;;  %4813 = vmatpush1.bf16.msra.mxu0 %v5780_v4 }
  0xc3   : > { %v6413_v17 = vrot.slane %v659_v50, %v6125_v57  ;;  %v689_v7 = vrot.slane %v661_v8, %v6125_v57  ;;  %v2207_v32 = vcombine.high %v2199_v56, %v2199_v56  ;;  %v2208_v36 = vcombine.high %v2206_v27, %v2206_v27  ;;  %4814 = vmatprep.subr.bf16.mxu0 %v7599_v38 }
  0xc4   : > { %v2588_v5 = vcombine.low %v2566_v3, %v2573_v52  ;;  %v2589_v34 = vcombine.low %v2580_v16, %v2587_v21  ;;  %v440_v53 = vsel %vm428_vm2, %v423_v24, %v406_v43  ;;  %v938_v54 = vrot.slane %v930_v2, %v6125_v57  ;;  %v1971_v24 = vpop.permute.xlu1 %1970 }
  0xc5   : > { %v945_v58 = vrot.slane %v931_v30, %v6125_v57  ;;  %v6427_v51 = vrot.slane %v2160_v0, %v6125_v57  ;;  %v6433_v4 = vcombine.high %v6372_v44, %v6372_v44  ;;  %v2432_v43 = vunpack.i.h.s16 %v6369_v55  ;;  %v5782_v0 = vld [vmem:[%s7553_s3 + $0x18] sm:$0xff]  }
  0xc6   : > { %v2596_v26 = vrot.slane %v2588_v5, %v6125_v57  ;;  %v2603_v50 = vrot.slane %v2589_v34, %v6125_v57  ;;  %v998_v8 = vcombine.low %v668_v49, %v682_v47  ;;  %v6437_v52 = vrot.slane %v2199_v56, %v6125_v57  ;;  %4815 = vmatpush1.bf16.msra.mxu0 %v5781_v29 }
  0xc7   : > { %v946_v21 = vcombine.low %v938_v54, %v945_v58  ;;  %v5443_v2 = vcombine.high %v668_v49, %v682_v47  ;;  %v6443_v5 = vrot.slane %v2206_v27, %v6125_v57  ;;  %v693_v34 = vcombine.high %v440_v53, %v440_v53  ;;  %4816 = vmatprep.subr.bf16.mxu0 %v7599_v38  ;;  %v376_v27 = vpop.permute.xlu0 %375 }
  0xc8   : > { %v2604_v16 = vcombine.low %v2596_v26, %v2603_v50  ;;  %v700_v30 = vrot.slane %v440_v53, %v6125_v57  ;;  %v1045_v56 = vcombine.low %v6413_v17, %v689_v7  ;;  %v6450_v26 = vrot.slane %v2207_v32, %v6125_v57 }
  0xc9   : > { %v6453_v29 = vrot.slane %v2208_v36, %v6125_v57  ;;  %5630 = vmatmul.mubr.msk.bf16.gmra.mxu0 %vm1228_vm3, %v946_v21  ;;  %v7605_v50 = vcombine.high %v6292_v33, %v6292_v33  ;;  %v6469_v32 = vpack.i.b16 %v6427_v51, %v2432_v43  ;;  %v6472_v36 = vrot.slane %v998_v8, %v6125_v57  ;;  %v5783_v33 = vld [vmem:[%s7553_s3 + $0x10] sm:$0xff]  }
  0xca   : > { %5670 = vmatmul.mubr.bf16.vlgmr.msra.gmra.mxu1 %v2604_v16  ;;  %v6475_v54 = vsel %vm1228_vm3, %v440_v53, %v1971_v24  ;;  %v2404_v58 = vunpack.i.h.s16 %v6257_v9  ;;  %5633 = vmatprep.mubr.msk.bf16.mxu0 %vm5880_vm0, %v7597_v45  ;;  %v6484_v16 = vrot.slane %v5443_v2, %v6125_v57  ;;  %v707_v8 = vrot.slane %v693_v34, %v6125_v57  ;;  %v408_v24 = vpop.permute.xlu1 %407 }
  0xcb   : > { %v6464_v7 = vpack.i.b16 %v6348_v37, %v7605_v50  ;;  %5673 = vmatprep.mubr.msk.bf16.mxu1 %vm5880_vm0, %v7597_v45  ;;  %7606 = vst [vmem:[#allocation17_spill] sm:$0xff] %v6475_v54  ;;  %4817 = vmatpush1.bf16.msra.mxu0 %v5782_v0  ;;  %v708_v53 = vcombine.high %v700_v30, %v700_v30  ;;  %v7607_v3 = vunpack.i.h.s16 %v6230_v40  ;;  %v7608_v2 = vunpack.i.h.s16 %v6239_v48 }
  0xcc   : > { %4818 = vmatprep.subr.bf16.mxu0 %v7599_v38  ;;  %v6491_v21 = vrot.slane %v1045_v56, %v6125_v57  ;;  %v691_v34 = vcombine.high %v6413_v17, %v6413_v17  ;;  %v2240_v47 = vcombine.high %v6475_v54, %v6475_v54  ;;  %v425_v56 = vsel %vm411_vm1, %v6060_v63, %v376_v27  ;;  %v378_v63 = vpop.permute.xlu0 %377 }
  0xcd   : > { %v5460_v0 = vpack.i.b16 %v6239_v48, %v7607_v3  ;;  %v716_v49 = vrot.slane %v700_v30, %v6125_v57  ;;  %v442_v50 = vsel %vm428_vm2, %v425_v56, %v408_v24  ;;  %v5461_v43 = vpack.i.b16 %v6257_v9, %v7608_v2 }
  0xce   : > { %v5462_v17 = vpack.i.b16 %v6209_v25, %v2404_v58  ;;  %v709_v27 = vcombine.high %v707_v8, %v707_v8  ;;  %v723_v40 = vrot.slane %v707_v8, %v6125_v57  ;;  %v730_v3 = vrot.slane %v708_v53, %v6125_v57 }
  0xcf   : > { %4819 = vmatpush1.bf16.msra.mxu0 %v5783_v33  ;;  %v2247_v30 = vrot.slane %v6475_v54, %v6125_v57  ;;  %v2605_v48 = vcombine.low %v5460_v0, %v5461_v43  ;;  %v7609_v25 = vcombine.low %v6272_v10, %v6270_v6  ;;  %v2636_v33 = vrot.slane %v6337_v20, %v6125_v57  ;;  %v5785_v6 = vld [vmem:[%s7553_s3] sm:$0xff]  }
  0xd0   : > { %4820 = vmatprep.subr.bf16.mxu0 %v7599_v38  ;;  %v2606_v9 = vcombine.low %v5462_v17, %v6262_v19  ;;  %v738_v24 = vcombine.high %v716_v49, %v716_v49  ;;  %v2254_v8 = vrot.slane %v2240_v47, %v6125_v57  ;;  %v741_v53 = vcombine.high %v442_v50, %v442_v50  ;;  %v1973_v17 = vpop.permute.xlu1 %1972 }
  0xd1   : > { %v2629_v58 = vrot.slane %v7609_v25, %v6125_v57  ;;  %v748_v2 = vrot.slane %v442_v50, %v6125_v57  ;;  %v6531_v56 = vcombine.low %v691_v34, %v716_v49  ;;  %v2615_v43 = vrot.slane %v2605_v48, %v6125_v57 }
  0xd2   : > { %v2622_v19 = vrot.slane %v2606_v9, %v6125_v57  ;;  %v737_v10 = vrot.slane %v709_v27, %v6125_v57  ;;  %v740_v20 = vcombine.high %v730_v3, %v730_v3  ;;  %v2255_v47 = vcombine.high %v2247_v30, %v2247_v30 }
  0xd3   : > { %v2638_v0 = vcombine.low %v2629_v58, %v2636_v33  ;;  %4821 = vmatpush1.bf16.msra.mxu0 %v5784_v42  ;;  %v979_v25 = vcombine.low %v6312_v46, %v6335_v41  ;;  %v739_v49 = vcombine.high %v723_v40, %v723_v40  ;;  %v7610_v42 = vrot.slane %v6331_v1, %v6125_v57 }
  0xd4   : > { %4822 = vmatprep.subr.bf16.mxu0 %v7599_v38  ;;  %v2637_v34 = vcombine.low %v2615_v43, %v2622_v19  ;;  %v7611_v9 = vrot.slane %v6321_v61, %v6125_v57  ;;  %v6549_v33 = vcombine.low %v730_v3, %v738_v24  ;;  %v755_v27 = vrot.slane %v741_v53, %v6125_v57 }
  0xd5   : > { %v2652_v48 = vrot.slane %v2638_v0, %v6125_v57  ;;  %v756_v54 = vcombine.high %v748_v2, %v748_v2  ;;  %v6553_v46 = vsel %vm1228_vm3, %v442_v50, %v1973_v17  ;;  %v2256_v41 = vcombine.high %v2254_v8, %v2254_v8 }
  0xd6   : > { %v980_v58 = vcombine.low %v7611_v9, %v7610_v42  ;;  %7612 = vst [vmem:[#allocation18_spill] sm:$0xff] %v6553_v46  ;;  %v2645_v43 = vrot.slane %v2637_v34, %v6125_v57  ;;  %v987_v19 = vrot.slane %v979_v25, %v6125_v57  ;;  %v6558_v0 = vcombine.low %v740_v20, %v723_v40 }
  0xd7   : > { %4823 = vmatpush1.bf16.msra.mxu0 %v5785_v6  ;;  %v6563_v3 = vrot.slane %v2247_v30, %v6125_v57  ;;  %v6566_v24 = vrot.slane %v2254_v8, %v6125_v57  ;;  %v6570_v50 = vrot.slane %v2255_v47, %v6125_v57  ;;  %v2295_v40 = vrot.slane %v6553_v46, %v6125_v57  ;;  %v5786_v8 = vld [vmem:[%s7553_s3 + $0x48] sm:$0xff]   ;;  %v5787_v6 = vld [vmem:[%s7553_s3 + $0x40] sm:$0xff]   ;;  %v1975_v47 = vpop.permute.xlu1 %1974 }
  0xd8   : > { %v994_v1 = vrot.slane %v980_v58, %v6125_v57  ;;  %4836 = vmatprep.subr.bf16.mxu0 %v7599_v38  ;;  %v2653_v53 = vcombine.low %v2645_v43, %v2652_v48  ;;  %v757_v20 = vcombine.high %v755_v27, %v755_v27  ;;  %v764_v30 = vrot.slane %v748_v2, %v6125_v57 }
  0xd9   : > { %v778_v25 = vrot.slane %v756_v54, %v6125_v57  ;;  %v6582_v34 = vcombine.low %v737_v10, %v739_v49  ;;  %v2284_v48 = vrot.slane %v2256_v41, %v6125_v57  ;;  %v2288_v42 = vcombine.high %v6553_v46, %v6553_v46  ;;  %v410_v49 = vpop.permute.xlu0 %409 }
  0xda   : > { %v995_v17 = vcombine.low %v987_v19, %v994_v1  ;;  %5674 = vmatmul.mubr.bf16.gmra.mxu1 %v2653_v53  ;;  %v6592_v54 = vcombine.high %v6563_v3, %v6563_v3  ;;  %v427_v10 = vsel %vm411_vm1, %v6076_v18, %v378_v63  ;;  %v6601_v58 = vcombine.high %v6570_v50, %v6570_v50 }
  0xdb   : > { %5677 = vmatprep.mubr.msk.bf16.mxu1 %vm5880_vm0, %v7597_v45  ;;  %v2458_v41 = vunpack.i.h.s16 %v6566_v24  ;;  %v7613_v43 = vcombine.high %v6443_v5, %v6443_v5  ;;  %v2303_v1 = vcombine.high %v2295_v40, %v2295_v40  ;;  %v6614_v53 = vrot.slane %v755_v27, %v6125_v57  ;;  %4837 = vmatpush2.bf16.msra.mxu0 %v5786_v8 }
  0xdc   : > { %5634 = vmatmul.mubr.msk.bf16.gmra.mxu0 %vm1228_vm3, %v995_v17  ;;  %v785_v17 = vrot.slane %v757_v20, %v6125_v57  ;;  %v1095_v61 = vcombine.low %v764_v30, %v778_v25  ;;  %v5444_v2 = vcombine.high %v764_v30, %v778_v25  ;;  %v444_v9 = vsel %vm428_vm2, %v427_v10, %v410_v49 }
  0xdd   : > { %v6608_v19 = vpack.i.b16 %v6563_v3, %v7613_v43  ;;  %5637 = vmatprep.mubr.msk.bf16.mxu0 %vm5880_vm0, %v7597_v45  ;;  %v2302_v43 = vrot.slane %v2288_v42, %v6125_v57  ;;  %v2430_v18 = vunpack.i.h.s16 %v6433_v4  ;;  %4838 = vmatprep.subr.bf16.mxu0 %v7599_v38  ;;  %v6625_v27 = vrot.slane %v2295_v40, %v6125_v57 }
  0xde   : > { %v2460_v20 = vunpack.i.h.s16 %v2284_v48  ;;  %v789_v63 = vcombine.high %v444_v9, %v444_v9  ;;  %v796_v8 = vrot.slane %v444_v9, %v6125_v57  ;;  %v6629_v22 = vpack.i.b16 %v2284_v48, %v2458_v41 }
  0xdf   : > { %v2286_v30 = vcombine.high %v6566_v24, %v6566_v24  ;;  %v2325_v25 = vrot.slane %v2303_v1, %v6125_v57  ;;  %v1097_v42 = vcombine.low %v6614_v53, %v785_v17  ;;  %v6636_v38 = vrot.slane %v1095_v61, %v6125_v57  ;;  %4839 = vmatpush2.bf16.msra.mxu0 %v5787_v6 }
  0xe0   : > { %v803_v40 = vrot.slane %v789_v63, %v6125_v57  ;;  %v6640_v10 = vsel %vm1228_vm3, %v444_v9, %v1975_v47  ;;  %v6643_v49 = vrot.slane %v5444_v2, %v6125_v57  ;;  %v2304_v48 = vcombine.high %v2302_v43, %v2302_v43 }
  0xe1   : > { %v7614_v41 = vunpack.i.h.s16 %v6372_v44  ;;  %v5469_v1 = vpack.i.b16 %v6369_v55, %v2430_v18  ;;  %v6650_v17 = vrot.slane %v2302_v43, %v6125_v57  ;;  %v2333_v61 = vcombine.high %v6625_v27, %v6625_v27 }
  0xe2   : > { %v6654_v63 = vpack.i.b16 %v2286_v30, %v2460_v20  ;;  %v804_v47 = vcombine.high %v796_v8, %v796_v8  ;;  %v2335_v6 = vcombine.high %v2325_v25, %v2325_v25  ;;  %v2343_v2 = vrot.slane %v6640_v10, %v6125_v57 }
  0xe3   : > { %v5467_v46 = vpack.i.b16 %v6409_v13, %v7614_v41  ;;  %v7615_v9 = vunpack.i.h.s16 %v6348_v37  ;;  %v7616_v41 = vunpack.i.h.s16 %v6409_v13  ;;  %v6665_v43 = vrot.slane %v1097_v42, %v6125_v57 }
  0xe4   : > { %v805_v11 = vcombine.high %v803_v40, %v803_v40  ;;  %v6668_v20 = vrot.slane %v796_v8, %v6125_v57  ;;  %v2336_v30 = vcombine.high %v6640_v10, %v6640_v10  ;;  %v6673_v12 = vrot.slane %v2304_v48, %v6125_v57 }
  0xe5   : > { %v5466_v60 = vpack.i.b16 %v6372_v44, %v7615_v9  ;;  %v5468_v18 = vpack.i.b16 %v6433_v4, %v7616_v41  ;;  %v2655_v37 = vcombine.low %v6318_v39, %v6464_v7  ;;  %v2334_v4 = vcombine.high %v6650_v17, %v6650_v17 }
  0xe6   : > { %v2755_v42 = vcombine.low %v6654_v63, %v6625_v27  ;;  %v6682_v8 = vrot.slane %v803_v40, %v6125_v57  ;;  %v6685_v9 = vrot.slane %v804_v47, %v6125_v57  ;;  %v6687_v41 = vcombine.low %v2325_v25, %v2333_v61 }
  0xe7   : > { %v2656_v44 = vcombine.low %v5466_v60, %v5467_v46  ;;  %v2657_v13 = vcombine.low %v5468_v18, %v5469_v1  ;;  %v6690_v48 = vcombine.low %v2335_v6, %v6650_v17  ;;  %v787_v60 = vcombine.high %v6614_v53, %v6614_v53 }
  0xe8   : > { %v2351_v39 = vcombine.high %v2343_v2, %v2343_v2  ;;  %v6695_v7 = vrot.slane %v805_v11, %v6125_v57  ;;  %v834_v46 = vcombine.high %v6668_v20, %v6668_v20  ;;  %v6700_v27 = vrot.slane %v2336_v30, %v6125_v57 }
  0xe9   : > { %v2359_v40 = vrot.slane %v2343_v2, %v6125_v57  ;;  %v2664_v25 = vrot.slane %v6340_v14, %v6125_v57  ;;  %v2671_v1 = vrot.slane %v2655_v37, %v6125_v57  ;;  %v2678_v17 = vrot.slane %v2656_v44, %v6125_v57 }
  0xea   : > { %v2685_v53 = vrot.slane %v2657_v13, %v6125_v57  ;;  %v835_v11 = vcombine.high %v6682_v8, %v6682_v8  ;;  %v836_v61 = vcombine.high %v6685_v9, %v6685_v9  ;;  %v1013_v63 = vrot.slane %v6405_v62, %v6125_v57 }
  0xeb   : > { %v1029_v47 = vcombine.low %v6472_v36, %v6484_v16  ;;  %v6717_v14 = vrot.slane %v2351_v39, %v6125_v57  ;;  %v2686_v6 = vcombine.low %v2664_v25, %v2671_v1  ;;  %v7617_v18 = vunpack.i.h.s16 %v6427_v51 }
  0xec   : > { %v2687_v2 = vcombine.low %v2678_v17, %v2685_v53  ;;  %v7618_v30 = vcombine.high %v6369_v55, %v6369_v55  ;;  %v7619_v44 = vrot.slane %v6365_v59, %v6125_v57  ;;  %v7620_v36 = vcombine.low %v6437_v52, %v6450_v26 }
  0xed   : > { %v1043_v62 = vrot.slane %v1029_v47, %v6125_v57  ;;  %v7621_v39 = vcombine.high %v6437_v52, %v6450_v26  ;;  %v2694_v25 = vrot.slane %v2686_v6, %v6125_v57  ;;  %v7622_v59 = vcombine.low %v6443_v5, %v6453_v29 }
  0xee   : > { %v5471_v37 = vpack.i.b16 %v7618_v30, %v7617_v18  ;;  %v1028_v13 = vcombine.low %v7619_v44, %v1013_v63  ;;  %v2720_v16 = vrot.slane %v7620_v36, %v6125_v57  ;;  %v2701_v55 = vrot.slane %v2687_v2, %v6125_v57 }
  0xef   : > { %v2727_v51 = vrot.slane %v7621_v39, %v6125_v57  ;;  %v2734_v17 = vrot.slane %v7622_v59, %v6125_v57  ;;  %v2352_v53 = vcombine.high %v6700_v27, %v6700_v27  ;;  %v6745_v63 = vcombine.high %v2359_v40, %v2359_v40 }
  0xf0   : > { %v2703_v1 = vcombine.low %v6469_v32, %v5471_v37  ;;  %v1036_v47 = vrot.slane %v1028_v13, %v6125_v57  ;;  %v2456_v52 = vunpack.i.h.s16 %v6601_v58  ;;  %v2702_v26 = vcombine.low %v2694_v25, %v2701_v55 }
  0xf1   : > { %v2736_v2 = vcombine.low %v2727_v51, %v2734_v17  ;;  %v7623_v32 = vunpack.i.h.s16 %v6563_v3  ;;  %v2478_v5 = vunpack.i.h.s16 %v6717_v14  ;;  %v7624_v30 = vrot.slane %v6558_v0, %v6125_v57 }
  0xf2   : > { %v2713_v6 = vrot.slane %v2703_v1, %v6125_v57  ;;  %v1044_v29 = vcombine.low %v1036_v47, %v1043_v62  ;;  %v7625_v37 = vrot.slane %v6549_v33, %v6125_v57  ;;  %v7626_v13 = vunpack.i.h.s16 %v6570_v50  ;;  %5678 = vmatmul.mubr.bf16.gmra.mxu1 %v2702_v26 }
  0xf3   : > { %v5473_v18 = vpack.i.b16 %v6570_v50, %v7623_v32  ;;  %v2476_v39 = vunpack.i.h.s16 %v2359_v40  ;;  %v7627_v3 = vunpack.i.h.s16 %v6592_v54  ;;  %v5476_v62 = vpack.i.b16 %v6566_v24, %v2456_v52  ;;  %5681 = vmatprep.mubr.msk.bf16.mxu1 %vm5880_vm0, %v7597_v45 }
  0xf4   : > { %v1078_v44 = vcombine.low %v7625_v37, %v7624_v30  ;;  %v5474_v36 = vpack.i.b16 %v6592_v54, %v7626_v13  ;;  %v2735_v51 = vcombine.low %v2713_v6, %v2720_v16  ;;  %5638 = vmatmul.mubr.msk.bf16.gmra.mxu0 %vm1228_vm3, %v1044_v29  ;;  %v2750_v33 = vrot.slane %v2736_v2, %v6125_v57 }
  0xf5   : > { %v5475_v25 = vpack.i.b16 %v6601_v58, %v7627_v3  ;;  %v7628_v0 = vrot.slane %v6531_v56, %v6125_v57  ;;  %v2752_v16 = vcombine.low %v6608_v19, %v5473_v18  ;;  %5641 = vmatprep.mubr.msk.bf16.mxu0 %vm5880_vm0, %v7597_v45  ;;  %v2754_v58 = vcombine.low %v5476_v62, %v6629_v22 }
  0xf6   : > { %v2743_v54 = vrot.slane %v2735_v51, %v6125_v57  ;;  %v2783_v55 = vrot.slane %v2755_v42, %v6125_v57  ;;  %v1145_v1 = vcombine.low %v836_v61, %v6682_v8  ;;  %v5479_v59 = vpack.i.b16 %v2359_v40, %v2334_v4 }
  0xf7   : > { %v1077_v50 = vcombine.low %v6491_v21, %v7628_v0  ;;  %v2753_v24 = vcombine.low %v5474_v36, %v5475_v25  ;;  %v1092_v17 = vrot.slane %v1078_v44, %v6125_v57  ;;  %v5481_v56 = vpack.i.b16 %v6745_v63, %v2478_v5 }
  0xf8   : > { %v2380_v21 = vrot.slane %v2352_v53, %v6125_v57  ;;  %v2776_v47 = vrot.slane %v2754_v58, %v6125_v57  ;;  %v5480_v52 = vpack.i.b16 %v6717_v14, %v2476_v39  ;;  %v1143_v26 = vcombine.low %v787_v60, %v6668_v20 }
  0xf9   : > { %v2769_v19 = vrot.slane %v2753_v24, %v6125_v57  ;;  %v1085_v22 = vrot.slane %v1077_v50, %v6125_v57  ;;  %v2762_v42 = vrot.slane %v2752_v16, %v6125_v57  ;;  %v1127_v4 = vcombine.low %v6643_v49, %v6665_v43 }
  0xfa   : > { %v1146_v8 = vcombine.low %v6695_v7, %v835_v11  ;;  %v2751_v40 = vcombine.low %v2743_v54, %v2750_v33  ;;  %v2785_v61 = vcombine.low %v2776_v47, %v2783_v55  ;;  %v2804_v53 = vcombine.low %v5480_v52, %v5481_v56  ;;  %v7631_v56 = vld [vmem:[#allocation12_spill] sm:$0xff]  ;;  %v7632_v47 = vld [vmem:[#allocation15_spill] sm:$0xff] }
  0xfb   : > { %v1093_v6 = vcombine.low %v1085_v22, %v1092_v17  ;;  %v2784_v2 = vcombine.low %v2762_v42, %v2769_v19  ;;  %v1104_v32 = vrot.slane %v6582_v34, %v6125_v57  ;;  %v2803_v18 = vcombine.low %v6673_v12, %v5479_v59  ;;  %v7633_v42 = vld [vmem:[#allocation13_spill] sm:$0xff] }
  0xfc   : > { %v1144_v60 = vcombine.low %v6685_v9, %v834_v46  ;;  %v1167_v5 = vrot.slane %v1145_v1, %v6125_v57  ;;  %v2366_v49 = vrot.slane %v6700_v27, %v6125_v57  ;;  %v2486_v43 = vunpack.i.h.s16 %v2380_v21  ;;  %5682 = vmatmul.mubr.bf16.gmra.mxu1 %v2751_v40 }
  0xfd   : > { %5642 = vmatmul.mubr.msk.bf16.gmra.mxu0 %vm1228_vm3, %v1093_v6  ;;  %5685 = vmatprep.mubr.msk.bf16.mxu1 %vm5880_vm0, %v7597_v45  ;;  %v1126_v34 = vcombine.low %v1104_v32, %v6636_v38  ;;  %v1141_v12 = vrot.slane %v1127_v4, %v6125_v57  ;;  %v2818_v20 = vrot.slane %v6690_v48, %v6125_v57  ;;  %v2480_v9 = vunpack.i.h.s16 %v6745_v63 }
  0xfe   : > { %v2799_v7 = vrot.slane %v2785_v61, %v6125_v57  ;;  %5645 = vmatprep.mubr.msk.bf16.mxu0 %vm5880_vm0, %v7597_v45  ;;  %v2832_v46 = vrot.slane %v2804_v53, %v6125_v57  ;;  %v6818_v27 = vrot.slane %v6215_v28, %v6140_v15  ;;  %v6822_v38 = vrot.slane %v6161_v35, %v6140_v15 }
  0xff   : > { %v2792_v11 = vrot.slane %v2784_v2, %v6125_v57  ;;  %v2825_v48 = vrot.slane %v2803_v18, %v6125_v57  ;;  %v1174_v63 = vrot.slane %v1146_v8, %v6125_v57  ;;  %v2383_v29 = vcombine.high %v6717_v14, %v6717_v14 }
 0x100   : > { %v4632_v30 = vcombine.low %v6818_v27, %v6822_v38  ;;  %v4633_v28 = vcombine.high %v6818_v27, %v6822_v38  ;;  %v2382_v37 = vcombine.high %v2366_v49, %v2366_v49  ;;  %v2484_v44 = vunpack.i.h.s16 %v2366_v49 }
 0x101   : > { %v1153_v35 = vrot.slane %v1143_v26, %v6125_v57  ;;  %v1160_v13 = vrot.slane %v1144_v60, %v6125_v57  ;;  %v1134_v36 = vrot.slane %v1126_v34, %v6125_v57  ;;  %v2482_v39 = vunpack.i.h.s16 %v2383_v29  ;;  %v7635_v34 = vld [vmem:[#allocation6_spill] sm:$0xff] }
 0x102   : > { %v2800_v51 = vcombine.low %v2792_v11, %v2799_v7  ;;  %v2811_v3 = vrot.slane %v6687_v41, %v6125_v57  ;;  %v2834_v14 = vcombine.low %v2825_v48, %v2832_v46  ;;  %v5485_v25 = vpack.i.b16 %v2382_v37, %v2486_v43  ;;  %v7638_v46 = vld [vmem:[#allocation8_spill] sm:$0xff] }
 0x103   : > { %v4455_v62 = vrot.slane %v6018_v23, 2  ;;  %v1142_v33 = vcombine.low %v1134_v36, %v1141_v12  ;;  %v1176_v0 = vcombine.low %v1167_v5, %v1174_v63  ;;  %v5483_v50 = vpack.i.b16 %v2366_v49, %v2482_v39  ;;  %v7634_v5 = vld [vmem:[#allocation7_spill] sm:$0xff] }
 0x104   : > { %v4502_v16 = vrot.slane %v6277_v31, %v6140_v15  ;;  %5686 = vmatmul.mubr.bf16.gmra.mxu1 %v2800_v51  ;;  %v2833_v54 = vcombine.low %v2811_v3, %v2818_v20  ;;  %v5482_v24 = vpack.i.b16 %v2383_v29, %v2480_v9  ;;  %v5484_v58 = vpack.i.b16 %v2380_v21, %v2484_v44  ;;  %v7629_v31 = vld [vmem:[#allocation5_spill] sm:$0xff]  ;;  %v7637_v20 = vld [vmem:[#allocation14_spill] sm:$0xff]  ;;  %v7639_v29 = vld [vmem:[#allocation16_spill] sm:$0xff] }
 0x105   : > { %5646 = vmatmul.mubr.msk.bf16.gmra.mxu0 %vm1228_vm3, %v1142_v33  ;;  %5689 = vmatprep.mubr.msk.bf16.mxu1 %vm5880_vm0, %v7597_v45  ;;  %v1175_v41 = vcombine.low %v1153_v35, %v1160_v13  ;;  %v2848_v55 = vrot.slane %v2834_v14, %v6125_v57  ;;  %v1190_v59 = vrot.slane %v1176_v0, %v6125_v57  ;;  %v7630_v17 = vrot.slane %v7629_v31, 2  ;;  %v7640_v13 = vld [vmem:[#allocation9_spill] sm:$0xff] }
 0x106   : > { %5649 = vmatprep.mubr.msk.bf16.mxu0 %vm5880_vm0, %v7597_v45  ;;  %v2850_v23 = vcombine.low %v5482_v24, %v5483_v50  ;;  %v2851_v1 = vcombine.low %v5484_v58, %v5485_v25  ;;  %v4510_v21 = vcombine.high %v4502_v16, %v4502_v16  ;;  %v4511_v52 = vcombine.low %v7632_v47, %v4455_v62  ;;  %v7641_v51 = vld [vmem:[#allocation17_spill] sm:$0xff]  ;;  %v7642_v50 = vld [vmem:[#allocation18_spill] sm:$0xff] }
 0x107   : > { %v4478_v19 = vcombine.high %v7631_v56, %v7630_v17  ;;  %v2841_v26 = vrot.slane %v2833_v54, %v6125_v57  ;;  %v1183_v22 = vrot.slane %v1175_v41, %v6125_v57  ;;  %v4493_v4 = vcombine.high %v7633_v42, %v7633_v42 }
 0x108   : > { %v2858_v40 = vrot.slane %v2850_v23, %v6125_v57  ;;  %v2865_v61 = vrot.slane %v2851_v1, %v6125_v57  ;;  %v4635_v2 = vcombine.low %v4502_v16, %v4510_v21  ;;  %v4519_v32 = vrot.slane %v4511_v52, %v6140_v15 }
 0x109   : > { %v2849_v8 = vcombine.low %v2841_v26, %v2848_v55  ;;  %v1191_v53 = vcombine.low %v1183_v22, %v1190_v59  ;;  %v4492_v6 = vrot.slane %v4478_v19, %v6140_v15  ;;  %v4512_v60 = vcombine.high %v7632_v47, %v4455_v62  ;;  %v7643_v55 = vld [vmem:[#allocation10_spill] sm:$0xff] }
 0x10a   : > { %v4456_v49 = vrot.slane %v7634_v5, 2  ;;  %v2866_v43 = vcombine.low %v2858_v40, %v2865_v61  ;;  %v7636_v12 = vrot.slane %v7635_v34, 2  ;;  %v4527_v7 = vcombine.high %v4519_v32, %v4519_v32 }
 0x10b   : > { %v4634_v18 = vcombine.low %v4493_v4, %v4492_v6  ;;  %v4457_v11 = vrot.slane %v7638_v46, 2  ;;  %v4649_v48 = vrot.slane %v4635_v2, %v6140_v15  ;;  %v4526_v63 = vrot.slane %v4512_v60, %v6140_v15 }
 0x10c   : > { %5690 = vmatmul.mubr.bf16.gmra.mxu1 %v2849_v8  ;;  %v4495_v9 = vcombine.high %v7637_v20, %v7636_v12  ;;  %v4528_v37 = vcombine.low %v7639_v29, %v4456_v49  ;;  %v2873_v44 = vrot.slane %v2866_v43, %v6125_v57  ;;  %v4529_v62 = vcombine.high %v7639_v29, %v4456_v49  ;;  %v5789_v29 = vld [vmem:[%s7555_s5 + $0x38] sm:$0xff]  }
 0x10d   : > { %5650 = vmatmul.mubr.msk.bf16.gmra.mxu0 %vm1228_vm3, %v1191_v53  ;;  %5693 = vmatprep.mubr.msk.bf16.mxu1 %vm5880_vm0, %v7597_v45  ;;  %v4642_v35 = vrot.slane %v4634_v18, %v6140_v15  ;;  %v4653_v39 = vcombine.low %v4527_v7, %v4526_v63  ;;  %v4545_v3 = vcombine.low %v7641_v51, %v4457_v11  ;;  %v4459_v23 = vrot.slane %v7643_v55, 2  ;;  %v5788_v7 = vld [vmem:[%s7555_s5 + $0x78] sm:$0xff]  }
 0x10e   : > { %5518 = vmatprep.mubr.msk.bf16.mxu0 %vm411_vm1, %v4633_v28  ;;  %v4458_v28 = vrot.slane %v7640_v13, 2  ;;  %v4509_v36 = vrot.slane %v4495_v9, %v6140_v15  ;;  %v4536_v33 = vrot.slane %v4528_v37, %v6140_v15  ;;  %v4543_v24 = vrot.slane %v4529_v62, %v6140_v15  ;;  %5582 = vmatprep.subr.bf16.mxu1 %v5788_v7 }
 0x10f   : > { %v4651_v14 = vcombine.high %v4642_v35, %v4649_v48  ;;  %v4553_v0 = vrot.slane %v4545_v3, %v6140_v15  ;;  %v4667_v54 = vrot.slane %v4653_v39, %v6140_v15  ;;  %v4650_v27 = vcombine.low %v4642_v35, %v4649_v48  ;;  %5583 = vmatpush3.bf16.msra.mxu1 %v5789_v29 }
 0x110   : > { %v4652_v25 = vcombine.low %v4509_v36, %v4519_v32  ;;  %v4562_v16 = vcombine.low %v7642_v50, %v4458_v28  ;;  %v4544_v58 = vcombine.high %v4536_v33, %v4536_v33  ;;  %v4546_v31 = vcombine.high %v7641_v51, %v4457_v11 }
 0x111   : > { %v4671_v38 = vcombine.low %v4543_v24, %v4553_v0  ;;  %v4579_v56 = vcombine.low %v6640_v10, %v4459_v23  ;;  %v4561_v21 = vcombine.high %v4553_v0, %v4553_v0  ;;  %v4580_v40 = vcombine.high %v6640_v10, %v4459_v23  ;;  %v5790_v0 = vld [vmem:[%s7555_s5 + $0x70] sm:$0xff]  }
 0x112   : > { %v4660_v41 = vrot.slane %v4652_v25, %v6140_v15  ;;  %v4670_v59 = vcombine.low %v4536_v33, %v4544_v58  ;;  %v4560_v26 = vrot.slane %v4546_v31, %v6140_v15  ;;  %v4563_v61 = vcombine.high %v7642_v50, %v4458_v28  ;;  %v5791_v50 = vld [vmem:[%s7555_s5 + $0x30] sm:$0xff]   ;;  %5584 = vmatprep.subr.bf16.mxu1 %v5790_v0 }
 0x113   : > { %v4685_v19 = vrot.slane %v4671_v38, %v6140_v15  ;;  %v4587_v42 = vrot.slane %v4579_v56, %v6140_v15  ;;  %v4594_v2 = vrot.slane %v4580_v40, %v6140_v15  ;;  %5585 = vmatpush3.bf16.msra.mxu1 %v5791_v50 }
 0x114   : > { %5694 = vmatmul.mubr.bf16.gmra.mxu1 %v2873_v44  ;;  %v4669_v1 = vcombine.high %v4660_v41, %v4667_v54  ;;  %v4678_v47 = vrot.slane %v4670_v59, %v6140_v15  ;;  %v4668_v52 = vcombine.low %v4660_v41, %v4667_v54  ;;  %v4688_v8 = vcombine.low %v4561_v21, %v4560_v26 }
 0x115   : > { %4841 = vmatmul.mubr.bf16.vlgmr.msra.gmra.mxu0 %v4632_v30  ;;  %v4570_v30 = vrot.slane %v4562_v16, %v6140_v15  ;;  %v4595_v53 = vcombine.high %v4587_v42, %v4587_v42  ;;  %v4577_v60 = vrot.slane %v4563_v61, %v6140_v15 }
 0x116   : > { %5519 = vmatprep.mubr.msk.bf16.mxu0 %vm411_vm1, %v4651_v14  ;;  %v4687_v4 = vcombine.high %v4678_v47, %v4685_v19  ;;  %v4696_v32 = vrot.slane %v4688_v8, %v6140_v15  ;;  %v4686_v18 = vcombine.low %v4678_v47, %v4685_v19 }
 0x117   : > { %v4578_v17 = vcombine.high %v4570_v30, %v4570_v30  ;;  %v4707_v5 = vcombine.low %v4595_v53, %v4594_v2  ;;  %v4706_v43 = vcombine.low %v4577_v60, %v4587_v42 }
 0x119   : > { %v4689_v22 = vcombine.low %v4570_v30, %v4578_v17  ;;  %v4721_v10 = vrot.slane %v4707_v5, %v6140_v15  ;;  %v4714_v34 = vrot.slane %v4706_v43, %v6140_v15 }
 0x11b   : > { %v4703_v6 = vrot.slane %v4689_v22, %v6140_v15  ;;  %v4723_v20 = vcombine.high %v4714_v34, %v4721_v10  ;;  %v4722_v9 = vcombine.low %v4714_v34, %v4721_v10 }
 0x11d   : > { %4849 = vmatmul.mubr.bf16.gmra.mxu0 %v4650_v27  ;;  %v4705_v49 = vcombine.high %v4696_v32, %v4703_v6  ;;  %v4704_v12 = vcombine.low %v4696_v32, %v4703_v6 }
 0x11e   : > { %5520 = vmatprep.mubr.msk.bf16.mxu0 %vm411_vm1, %v4669_v1 }
 0x125   : > { %4857 = vmatmul.mubr.bf16.gmra.mxu0 %v4668_v52 }
 0x126   : > { %5521 = vmatprep.mubr.msk.bf16.mxu0 %vm411_vm1, %v4687_v4 }
 0x12d   : > { %4865 = vmatmul.mubr.bf16.gmra.mxu0 %v4686_v18 }
 0x12e   : > { %5522 = vmatprep.mubr.msk.bf16.mxu0 %vm411_vm1, %v4705_v49 }
 0x135   : > { %4873 = vmatmul.mubr.bf16.gmra.mxu0 %v4704_v12 }
 0x136   : > { %5523 = vmatprep.mubr.msk.bf16.mxu0 %vm411_vm1, %v4723_v20 }
 0x13d   : > { %4881 = vmatmul.mubr.bf16.gmra.mxu0 %v4722_v9 }
 0x179   : > { %v1284_v46 = vpop.f32.mrf.mxu0 }
 0x17a   : > { %v1353_v11 = vcombine.high %v1284_v46, %v1284_v46  ;;  %v1360_v48 = vrot.slane %v1284_v46, %v6140_v15 }
 0x17b   : > { %v5627_v63 = vpop.f32.mrf.mxu0 }
 0x17c   : > { %v1367_v37 = vrot.slane %v1353_v11, %v6140_v15  ;;  %v1368_v44 = vcombine.high %v1360_v48, %v1360_v48 }
 0x17d   : > { %v1287_v35 = vpop.f32.mrf.mxu0 }
 0x17e   : > { %v1369_v13 = vcombine.high %v1367_v37, %v1367_v37  ;;  %v1370_v28 = vcombine.high %v1287_v35, %v1287_v35  ;;  %v1377_v36 = vrot.slane %v1287_v35, %v6140_v15  ;;  %v1591_v25 = vcombine.low %v1360_v48, %v1368_v44 }
 0x17f   : > { %v5628_v39 = vpop.f32.mrf.mxu0 }
 0x180   : > { %v1592_v51 = vcombine.low %v1367_v37, %v1369_v13  ;;  %v1384_v3 = vrot.slane %v1370_v28, %v6140_v15  ;;  %v1385_v14 = vcombine.high %v1377_v36, %v1377_v36  ;;  %v1599_v24 = vrot.slane %v1591_v25, %v6140_v15 }
 0x182   : > { %v1608_v62 = vcombine.low %v1377_v36, %v1385_v14  ;;  %v1606_v33 = vrot.slane %v1592_v51, %v6140_v15  ;;  %v1622_v54 = vrot.slane %v1384_v3, %v6140_v15  ;;  %v1386_v55 = vcombine.high %v1384_v3, %v1384_v3  ;;  %v5792_v51 = vld [vmem:[%s7555_s5 + $0x68] sm:$0xff]  }
 0x183   : > { %5586 = vmatprep.subr.bf16.mxu1 %v5792_v51 }
 0x184   : > { %v1615_v16 = vrot.slane %v1608_v62, %v6140_v15  ;;  %v1607_v41 = vcombine.low %v1599_v24, %v1606_v33 }
 0x186   : > { %v1623_v58 = vcombine.low %v1615_v16, %v1622_v54 }
 0x188   : > { %v1872_v27 = vsel %vm1871_vm4, %v1623_v58, -inf }
 0x189   : > { %v1292_v30 = vpop.f32.mrf.mxu0  ;;  %v1873_v23 = vmax.f32 %v1607_v41, %v1872_v27 }
 0x18a   : > { %v2963_v38 = vpop.f32.mrf.mxu1  ;;  %v1387_v31 = vcombine.high %v1292_v30, %v1292_v30  ;;  %v1394_v17 = vrot.slane %v1292_v30, %v6140_v15 }
 0x18b   : > { %v3030_v1 = vcombine.high %v2963_v38, %v2963_v38  ;;  %v3037_v59 = vrot.slane %v2963_v38, %v6125_v57  ;;  %v5631_v19 = vpop.f32.mrf.mxu0  ;;  %v1874_v21 = vrot.slane %v1873_v23, 4 }
 0x18c   : > { %v5671_v56 = vpop.f32.mrf.mxu1  ;;  %v1401_v26 = vrot.slane %v1387_v31, %v6140_v15  ;;  %v1402_v22 = vcombine.high %v1394_v17, %v1394_v17  ;;  %v1624_v42 = vcombine.low %v1386_v55, %v1394_v17 }
 0x18d   : > { %v3044_v47 = vrot.slane %v3030_v1, %v6125_v57  ;;  %v3045_v52 = vcombine.high %v3037_v59, %v3037_v59  ;;  %v1295_v8 = vpop.f32.mrf.mxu0  ;;  %v1875_v40 = vmax.f32 %v1873_v23, %v1874_v21  ;;  %v3053_v53 = vrot.slane %v3037_v59, %v6125_v57 }
 0x18e   : > { %v2966_v4 = vpop.f32.mrf.mxu1  ;;  %v1625_v32 = vcombine.low %v1402_v22, %v1401_v26  ;;  %v1632_v12 = vrot.slane %v1624_v42, %v6140_v15  ;;  %v1403_v24 = vcombine.high %v1401_v26, %v1401_v26  ;;  %v1404_v27 = vcombine.high %v1295_v8, %v1295_v8  ;;  %v5793_v26 = vld [vmem:[%s7555_s5 + $0x28] sm:$0xff]  }
 0x18f   : > { %v3046_v61 = vcombine.high %v3044_v47, %v3044_v47  ;;  %v3067_v6 = vrot.slane %v3045_v52, %v6125_v57  ;;  %v3060_v2 = vrot.slane %v3044_v47, %v6125_v57  ;;  %v3079_v18 = vcombine.high %v2966_v4, %v2966_v4  ;;  %v5632_v49 = vpop.f32.mrf.mxu0  ;;  %5587 = vmatpush3.bf16.msra.mxu1 %v5793_v26 }
 0x190   : > { %v3086_v60 = vrot.slane %v2966_v4, %v6125_v57  ;;  %v5672_v5 = vpop.f32.mrf.mxu1  ;;  %v1876_v20 = vrot.slane %v1875_v40, 2  ;;  %v1639_v9 = vrot.slane %v1625_v32, %v6140_v15  ;;  %v1411_v55 = vrot.slane %v1295_v8, %v6140_v15 }
 0x191   : > { %v3074_v43 = vrot.slane %v3046_v61, %v6125_v57  ;;  %v3667_v10 = vcombine.low %v3053_v53, %v3067_v6  ;;  %v5496_v34 = vcombine.high %v3053_v53, %v3067_v6  ;;  %v3093_v7 = vrot.slane %v3079_v18, %v6125_v57 }
 0x192   : > { %v3094_v46 = vcombine.high %v3086_v60, %v3086_v60  ;;  %v6944_v37 = vcombine.low %v1632_v12, %v1639_v9  ;;  %v3102_v36 = vrot.slane %v3086_v60, %v6125_v57  ;;  %v6954_v3 = vmax.f32 %v1875_v40, %v1876_v20 }
 0x193   : > { %v3669_v11 = vcombine.low %v3060_v2, %v3074_v43  ;;  %v5497_v48 = vcombine.high %v3060_v2, %v3074_v43  ;;  %v3677_v63 = vrot.slane %v3667_v10, %v6125_v57  ;;  %v3684_v29 = vrot.slane %v5496_v34, %v6125_v57  ;;  %v5794_v43 = vld [vmem:[%s7555_s5 + $0x60] sm:$0xff]  }
 0x194   : > { %v3095_v44 = vcombine.high %v3093_v7, %v3093_v7  ;;  %v3109_v35 = vrot.slane %v3093_v7, %v6125_v57  ;;  %v3116_v39 = vrot.slane %v3094_v46, %v6125_v57  ;;  %v1878_v38 = vrot.slane %v6954_v3, 1  ;;  %v5795_v46 = vld [vmem:[%s7555_s5 + $0x20] sm:$0xff]   ;;  %5588 = vmatprep.subr.bf16.mxu1 %v5794_v43 }
 0x195   : > { %v3691_v13 = vrot.slane %v3669_v11, %v6125_v57  ;;  %v3698_v28 = vrot.slane %v5497_v48, %v6125_v57  ;;  %v3699_v14 = vcombine.low %v3677_v63, %v3684_v29  ;;  %v1418_v31 = vrot.slane %v1404_v27, %v6140_v15  ;;  %5589 = vmatpush3.bf16.msra.mxu1 %v5795_v46  ;;  %v5800_v46 = vld [vmem:[%s7555_s5 + $0x48] sm:$0xff]  }
 0x196   : > { %v6957_v25 = vrot.slane %v3095_v44, %v6125_v57  ;;  %v3125_v62 = vcombine.high %v3109_v35, %v3109_v35  ;;  %v3716_v0 = vcombine.low %v3102_v36, %v3116_v39  ;;  %v5498_v50 = vcombine.high %v3102_v36, %v3116_v39 }
 0x197   : > { %v3700_v33 = vcombine.low %v3691_v13, %v3698_v28  ;;  %v3738_v16 = vrot.slane %v3109_v35, %v6125_v57  ;;  %v3707_v30 = vrot.slane %v3699_v14, %v6125_v57  ;;  %v1419_v17 = vcombine.high %v1411_v55, %v1411_v55 }
 0x198   : > { %v6961_v54 = vcombine.low %v6957_v25, %v3125_v62  ;;  %v3724_v58 = vrot.slane %v3716_v0, %v6125_v57  ;;  %v3731_v41 = vrot.slane %v5498_v50, %v6125_v57  ;;  %v1641_v56 = vcombine.low %v1403_v24, %v1411_v55 }
 0x199   : > { %v3714_v23 = vrot.slane %v3700_v33, %v6125_v57  ;;  %v3753_v59 = vrot.slane %v3738_v16, %v6125_v57  ;;  %v3127_v21 = vcombine.high %v6957_v25, %v6957_v25  ;;  %v1420_v42 = vcombine.high %v1418_v31, %v1418_v31 }
 0x19a   : > { %v3739_v1 = vcombine.low %v3724_v58, %v3731_v41  ;;  %v2971_v19 = vpop.f32.mrf.mxu1  ;;  %v3765_v47 = vrot.slane %v6961_v54, %v6125_v57  ;;  %v1648_v40 = vrot.slane %v1641_v56, %v6140_v15  ;;  %v1655_v61 = vrot.slane %v1419_v17, %v6140_v15 }
 0x19b   : > { %v3128_v4 = vcombine.high %v2971_v19, %v2971_v19  ;;  %v3135_v8 = vrot.slane %v2971_v19, %v6125_v57  ;;  %v3715_v18 = vcombine.low %v3707_v30, %v3714_v23  ;;  %v1657_v34 = vcombine.low %v1418_v31, %v1420_v42 }
 0x19c   : > { %v1300_v52 = vpop.f32.mrf.mxu0  ;;  %v3746_v22 = vrot.slane %v3739_v1, %v6125_v57  ;;  %v5675_v2 = vpop.f32.mrf.mxu1  ;;  %v1656_v10 = vcombine.low %v1648_v40, %v1655_v61  ;;  %v5797_v1 = vld [vmem:[%s7555_s5 + $0x18] sm:$0xff]  }
 0x19d   : > { %v1421_v53 = vcombine.high %v1300_v52, %v1300_v52  ;;  %v1428_v6 = vrot.slane %v1300_v52, %v6140_v15  ;;  %v3142_v5 = vrot.slane %v3128_v4, %v6125_v57  ;;  %v3143_v49 = vcombine.high %v3135_v8, %v3135_v8 }
 0x19e   : > { %v5635_v32 = vpop.f32.mrf.mxu0  ;;  %v3754_v60 = vcombine.low %v3746_v22, %v3753_v59  ;;  %v3151_v12 = vrot.slane %v3135_v8, %v6125_v57  ;;  %v2974_v9 = vpop.f32.mrf.mxu1  ;;  %v1880_v35 = vsel %vm1871_vm4, %v1656_v10, -inf  ;;  %v1665_v54 = vrot.slane %v1657_v34, %v6140_v15 }
 0x19f   : > { %v1435_v20 = vrot.slane %v1421_v53, %v6140_v15  ;;  %v3144_v48 = vcombine.high %v3142_v5, %v3142_v5  ;;  %v3158_v63 = vrot.slane %v3142_v5, %v6125_v57  ;;  %v1436_v29 = vcombine.high %v1428_v6, %v1428_v6  ;;  %v5799_v5 = vld [vmem:[%s7555_s5 + $0x10] sm:$0xff]  }
 0x1a0   : > { %v6989_v7 = vpop.f32.mrf.mxu0  ;;  %v4388_v11 = vsel %vm4387_vm5, %v3754_v60, -inf  ;;  %v3165_v13 = vrot.slane %v3143_v49, %v6125_v57  ;;  %v3173_v28 = vcombine.high %v3151_v12, %v3151_v12  ;;  %v5676_v36 = vpop.f32.mrf.mxu1  ;;  %v1881_v51 = vmax.f32 %v6944_v37, %v1880_v35  ;;  %v5796_v37 = vld [vmem:[%s7555_s5 + $0x58] sm:$0xff]   ;;  %v5798_v60 = vld [vmem:[%s7555_s5 + $0x50] sm:$0xff]  }
 0x1a1   : > { %v4389_v44 = vmax.f32 %v3715_v18, %v4388_v11  ;;  %v3172_v14 = vrot.slane %v3144_v48, %v6125_v57  ;;  %v3174_v25 = vcombine.high %v3158_v63, %v3158_v63  ;;  %v3756_v62 = vcombine.low %v3127_v21, %v3151_v12  ;;  %5590 = vmatprep.subr.bf16.mxu1 %v5796_v37 }
 0x1a2   : > { %v5636_v39 = vpop.f32.mrf.mxu0  ;;  %v3175_v0 = vcombine.high %v3165_v13, %v3165_v13  ;;  %v3757_v50 = vcombine.low %v3165_v13, %v3173_v28  ;;  %v1437_v16 = vcombine.high %v1435_v20, %v1435_v20  ;;  %v1882_v24 = vrot.slane %v1881_v51, 4  ;;  %5591 = vmatpush3.bf16.msra.mxu1 %v5797_v1 }
 0x1a3   : > { %v4390_v33 = vrot.slane %v4389_v44, 4  ;;  %v3772_v58 = vrot.slane %v3756_v62, %v6125_v57  ;;  %v1658_v41 = vcombine.low %v1428_v6, %v1436_v29  ;;  %v3804_v23 = vcombine.low %v3172_v14, %v3174_v25  ;;  %5592 = vmatprep.subr.bf16.mxu1 %v5798_v60  ;;  %v5802_v62 = vld [vmem:[%s7555_s5 + $0x40] sm:$0xff]  }
 0x1a4   : > { %v3758_v30 = vcombine.low %v3175_v0, %v3158_v63  ;;  %v3779_v55 = vrot.slane %v3757_v50, %v6125_v57  ;;  %v1883_v59 = vmax.f32 %v1881_v51, %v1882_v24  ;;  %v1674_v56 = vcombine.low %v1435_v20, %v1437_v16 }
 0x1a5   : > { %v4391_v27 = vmax.f32 %v4389_v44, %v4390_v33  ;;  %v3787_v31 = vcombine.low %v3765_v47, %v3772_v58  ;;  %v1672_v17 = vrot.slane %v1658_v41, %v6140_v15  ;;  %v3177_v52 = vcombine.high %v2974_v9, %v2974_v9  ;;  %v5801_v44 = vld [vmem:[%s7555_s5 + $0x8] sm:$0xff]   ;;  %v5803_v58 = vld [vmem:[%s7555_s5] sm:$0xff]  }
 0x1a6   : > { %v3786_v21 = vrot.slane %v3758_v30, %v6125_v57  ;;  %v3184_v26 = vrot.slane %v2974_v9, %v6125_v57  ;;  %v1884_v22 = vrot.slane %v1883_v59, 2  ;;  %v3176_v8 = vcombine.high %v3172_v14, %v3172_v14  ;;  %5593 = vmatpush3.bf16.msra.mxu1 %v5799_v5 }
 0x1a7   : > { %v4392_v19 = vrot.slane %v4391_v27, 2  ;;  %v3795_v42 = vrot.slane %v3787_v31, %v6125_v57  ;;  %v1673_v4 = vcombine.low %v1665_v54, %v1672_v17  ;;  %v3191_v47 = vrot.slane %v3177_v52, %v6125_v57  ;;  %5594 = vmatprep.subr.bf16.mxu1 %v5800_v46 }
 0x1a8   : > { %v3788_v61 = vcombine.low %v3779_v55, %v3786_v21  ;;  %v3192_v53 = vcombine.high %v3184_v26, %v3184_v26  ;;  %v1885_v6 = vmax.f32 %v1883_v59, %v1884_v22  ;;  %v3200_v2 = vrot.slane %v3184_v26, %v6125_v57 }
 0x1a9   : > { %v4393_v40 = vmax.f32 %v4391_v27, %v4392_v19  ;;  %v1438_v32 = vcombine.high %v6989_v7, %v6989_v7  ;;  %v1445_v18 = vrot.slane %v6989_v7, %v6140_v15  ;;  %v3193_v10 = vcombine.high %v3191_v47, %v3191_v47 }
 0x1aa   : > { %v3802_v43 = vrot.slane %v3788_v61, %v6125_v57  ;;  %v3812_v34 = vrot.slane %v3804_v23, %v6125_v57  ;;  %v1886_v12 = vrot.slane %v1885_v6, 1  ;;  %v3207_v20 = vrot.slane %v3191_v47, %v6125_v57  ;;  %5595 = vmatpush3.bf16.msra.mxu1 %v5801_v44 }
 0x1ab   : > { %v4394_v49 = vrot.slane %v4393_v40, 1  ;;  %v3214_v9 = vrot.slane %v3192_v53, %v6125_v57  ;;  %v3805_v7 = vcombine.low %v3176_v8, %v3200_v2  ;;  %v3221_v48 = vrot.slane %v3193_v10, %v6125_v57  ;;  %5596 = vmatprep.subr.bf16.mxu1 %v5802_v62 }
 0x1ac   : > { %v3803_v11 = vcombine.low %v3795_v42, %v3802_v43  ;;  %v1452_v63 = vrot.slane %v1438_v32, %v6140_v15  ;;  %v1453_v29 = vcombine.high %v1445_v18, %v1445_v18  ;;  %v1887_v35 = vmax.f32 %v1885_v6, %v1886_v12 }
 0x1ad   : > { %v3819_v13 = vrot.slane %v3805_v7, %v6125_v57  ;;  %v3826_v28 = vrot.slane %v3214_v9, %v6125_v57  ;;  %v5499_v36 = vcombine.high %v3200_v2, %v3214_v9  ;;  %v3844_v39 = vcombine.low %v3207_v20, %v3221_v48 }
 0x1ae   : > { %v5500_v51 = vcombine.high %v3207_v20, %v3221_v48  ;;  %v1681_v14 = vrot.slane %v1674_v56, %v6140_v15  ;;  %v1688_v25 = vrot.slane %v1445_v18, %v6140_v15  ;;  %v1879_v33 = vmax.f32 %v6954_v3, %v1878_v38  ;;  %5597 = vmatpush3.bf16.msra.mxu1 %v5803_v58 }
 0x1af   : > { %v3827_v0 = vcombine.low %v3812_v34, %v3819_v13  ;;  %v3853_v50 = vrot.slane %v5499_v36, %v6125_v57  ;;  %v3860_v16 = vrot.slane %v3844_v39, %v6125_v57  ;;  %v7049_v24 = vcombine.low %v1453_v29, %v1452_v63  ;;  %5697 = vmatprep.subr.bf16.mxu1 %v7597_v45 }
 0x1b0   : > { %v1689_v54 = vcombine.low %v1681_v14, %v1688_v25  ;;  %v7054_v41 = vmax.f32 %v4393_v40, %v4394_v49  ;;  %v3841_v30 = vrot.slane %v3826_v28, %v6125_v57  ;;  %v7059_v3 = vsel %vm5006_vm6, %v1887_v35, %v1879_v33 }
 0x1b1   : > { %v3834_v27 = vrot.slane %v3827_v0, %v6125_v57  ;;  %v7062_v38 = vrot.slane %v5500_v51, %v6125_v57  ;;  %v3875_v55 = vcombine.low %v3853_v50, %v3860_v16  ;;  %v1454_v1 = vcombine.high %v1452_v63, %v1452_v63 }
 0x1b2   : > { %v1888_v23 = vsel %vm1871_vm4, %v1689_v54, -inf  ;;  %v2979_v37 = vpop.f32.mrf.mxu1  ;;  %v1698_v52 = vrot.slane %v7049_v24, %v6140_v15 }
 0x1b3   : > { %v3842_v59 = vcombine.low %v3834_v27, %v3841_v30  ;;  %v1889_v31 = vmax.f32 %v1673_v4, %v1888_v23  ;;  %v3226_v17 = vcombine.high %v2979_v37, %v2979_v37  ;;  %v3233_v56 = vrot.slane %v2979_v37, %v6125_v57 }
 0x1b4   : > { %v1308_v19 = vpop.f32.mrf.mxu0  ;;  %v7067_v21 = vrot.slane %v3875_v55, %v6125_v57  ;;  %v5679_v42 = vpop.f32.mrf.mxu1 }
 0x1b5   : > { %v1455_v26 = vcombine.high %v1308_v19, %v1308_v19  ;;  %v1462_v22 = vrot.slane %v1308_v19, %v6140_v15  ;;  %v4396_v8 = vsel %vm4387_vm5, %v3842_v59, -inf  ;;  %v1890_v40 = vrot.slane %v1889_v31, 4 }
 0x1b6   : > { %v3240_v4 = vrot.slane %v3226_v17, %v6125_v57  ;;  %v3241_v61 = vcombine.high %v3233_v56, %v3233_v56  ;;  %v5639_v47 = vpop.f32.mrf.mxu0  ;;  %v4397_v53 = vmax.f32 %v3803_v11, %v4396_v8  ;;  %v3249_v6 = vrot.slane %v3233_v56, %v6125_v57  ;;  %v2982_v18 = vpop.f32.mrf.mxu1 }
 0x1b7   : > { %v1469_v2 = vrot.slane %v1455_v26, %v6140_v15  ;;  %v1470_v32 = vcombine.high %v1462_v22, %v1462_v22  ;;  %v1891_v60 = vmax.f32 %v1889_v31, %v1890_v40  ;;  %v1691_v20 = vcombine.low %v1454_v1, %v1462_v22 }
 0x1b8   : > { %v3242_v5 = vcombine.high %v3240_v4, %v3240_v4  ;;  %v3256_v49 = vrot.slane %v3240_v4, %v6125_v57  ;;  %v3263_v43 = vrot.slane %v3241_v61, %v6125_v57  ;;  %v7079_v10 = vpop.f32.mrf.mxu0  ;;  %v4398_v34 = vrot.slane %v4397_v53, 4  ;;  %v5680_v7 = vpop.f32.mrf.mxu1 }
 0x1b9   : > { %v1471_v12 = vcombine.high %v1469_v2, %v1469_v2  ;;  %v1707_v9 = vcombine.low %v1470_v32, %v1469_v2  ;;  %v1892_v46 = vrot.slane %v1891_v60, 2  ;;  %v1705_v13 = vrot.slane %v1691_v20, %v6140_v15 }
 0x1ba   : > { %v3270_v11 = vrot.slane %v3242_v5, %v6125_v57  ;;  %v3272_v48 = vcombine.high %v3256_v49, %v3256_v49  ;;  %v3846_v63 = vcombine.low %v3249_v6, %v3263_v43  ;;  %v5640_v29 = vpop.f32.mrf.mxu0  ;;  %v4399_v44 = vmax.f32 %v4397_v53, %v4398_v34 }
 0x1bb   : > { %v5501_v35 = vcombine.high %v3249_v6, %v3263_v43  ;;  %v1714_v28 = vrot.slane %v1707_v9, %v6140_v15  ;;  %v1893_v39 = vmax.f32 %v1891_v60, %v1892_v46  ;;  %v1706_v50 = vcombine.low %v1698_v52, %v1705_v13 }
 0x1bc   : > { %v7084_v36 = vpop.f32.mrf.mxu1  ;;  %v3874_v51 = vrot.slane %v3846_v63, %v6125_v57  ;;  %v3893_v14 = vcombine.low %v3256_v49, %v3270_v11  ;;  %v3914_v25 = vrot.slane %v3272_v48, %v6125_v57  ;;  %v4400_v33 = vrot.slane %v4399_v44, 2 }
 0x1bd   : > { %v7088_v62 = vpop.f32.mrf.mxu0  ;;  %v3900_v0 = vrot.slane %v5501_v35, %v6125_v57  ;;  %v1721_v16 = vrot.slane %v1471_v12, %v6140_v15  ;;  %v1894_v24 = vrot.slane %v1893_v39, 1  ;;  %v3274_v1 = vcombine.high %v3270_v11, %v3270_v11 }
 0x1be   : > { %v5683_v54 = vpop.f32.mrf.mxu1  ;;  %v3876_v58 = vcombine.low %v7062_v38, %v3874_v51  ;;  %v3907_v27 = vrot.slane %v3893_v14, %v6125_v57  ;;  %v3929_v30 = vrot.slane %v3914_v25, %v6125_v57  ;;  %v4401_v23 = vmax.f32 %v4399_v44, %v4400_v33 }
 0x1bf   : > { %v5643_v55 = vpop.f32.mrf.mxu0  ;;  %v1722_v37 = vcombine.low %v1714_v28, %v1721_v16  ;;  %v3275_v59 = vcombine.high %v2982_v18, %v2982_v18  ;;  %v7097_v17 = vmax.f32 %v1893_v39, %v1894_v24  ;;  %v3282_v52 = vrot.slane %v2982_v18, %v6125_v57 }
 0x1c0   : > { %v7095_v31 = vpop.f32.mrf.mxu1  ;;  %v3890_v56 = vrot.slane %v3876_v58, %v6125_v57  ;;  %v3915_v19 = vcombine.low %v3900_v0, %v3907_v27  ;;  %v4402_v38 = vrot.slane %v4401_v23, 1  ;;  %v1472_v8 = vcombine.high %v7079_v10, %v7079_v10 }
 0x1c1   : > { %v7101_v26 = vpop.f32.mrf.mxu0  ;;  %v1896_v22 = vsel %vm1871_vm4, %v1722_v37, -inf  ;;  %v3289_v42 = vrot.slane %v3275_v59, %v6125_v57  ;;  %v3290_v53 = vcombine.high %v3282_v52, %v3282_v52  ;;  %v3298_v18 = vrot.slane %v3282_v52, %v6125_v57 }
 0x1c2   : > { %v5684_v40 = vpop.f32.mrf.mxu1  ;;  %v3891_v4 = vcombine.low %v7067_v21, %v3890_v56  ;;  %v3922_v61 = vrot.slane %v3915_v19, %v6125_v57  ;;  %v1897_v47 = vmax.f32 %v1706_v50, %v1896_v22  ;;  %v7109_v2 = vmax.f32 %v4401_v23, %v4402_v38 }
 0x1c3   : > { %v5644_v6 = vpop.f32.mrf.mxu0  ;;  %v3291_v32 = vcombine.high %v3289_v42, %v3289_v42  ;;  %v3305_v60 = vrot.slane %v3289_v42, %v6125_v57  ;;  %v3312_v34 = vrot.slane %v3290_v53, %v6125_v57  ;;  %v1479_v21 = vrot.slane %v7079_v10, %v6140_v15 }
 0x1c4   : > { %v7113_v5 = vpop.f32.mrf.mxu1  ;;  %v3930_v49 = vcombine.low %v3922_v61, %v3929_v30  ;;  %v1898_v43 = vrot.slane %v1897_v47, 4  ;;  %v3320_v9 = vcombine.high %v3298_v18, %v3298_v18  ;;  %v3931_v46 = vcombine.low %v3274_v1, %v3298_v18 }
 0x1c5   : > { %v7118_v12 = vpop.f32.mrf.mxu0  ;;  %v3319_v20 = vrot.slane %v3291_v32, %v6125_v57  ;;  %v3321_v7 = vcombine.high %v3305_v60, %v3305_v60  ;;  %v3322_v29 = vcombine.high %v3312_v34, %v3312_v34  ;;  %v1486_v44 = vrot.slane %v1472_v8, %v6140_v15 }
 0x1c6   : > { %v5687_v11 = vpop.f32.mrf.mxu1  ;;  %v4404_v48 = vsel %vm4387_vm5, %v3930_v49, -inf  ;;  %v1899_v63 = vmax.f32 %v1897_v47, %v1898_v43  ;;  %v3932_v28 = vcombine.low %v3312_v34, %v3320_v9  ;;  %v3941_v10 = vrot.slane %v3931_v46, %v6125_v57 }
 0x1c7   : > { %v5647_v35 = vpop.f32.mrf.mxu0  ;;  %v4405_v13 = vmax.f32 %v3891_v4, %v4404_v48  ;;  %v3934_v39 = vcombine.low %v3319_v20, %v3321_v7  ;;  %v3933_v25 = vcombine.low %v3322_v29, %v3305_v60  ;;  %v1487_v33 = vcombine.high %v1479_v21, %v1479_v21 }
 0x1c8   : > { %v7124_v51 = vpop.f32.mrf.mxu1  ;;  %v1900_v14 = vrot.slane %v1899_v63, 2  ;;  %v1488_v0 = vcombine.high %v1486_v44, %v1486_v44  ;;  %v3948_v54 = vrot.slane %v3932_v28, %v6125_v57  ;;  %v3323_v58 = vcombine.high %v3319_v20, %v3319_v20 }
 0x1c9   : > { %v7126_v50 = vpop.f32.mrf.mxu0  ;;  %v4406_v16 = vrot.slane %v4405_v13, 4  ;;  %v3962_v24 = vrot.slane %v3934_v39, %v6125_v57  ;;  %v3955_v55 = vrot.slane %v3933_v25, %v6125_v57  ;;  %v1723_v23 = vcombine.low %v1479_v21, %v1487_v33 }
 0x1ca   : > { %v5688_v27 = vpop.f32.mrf.mxu1  ;;  %v1901_v30 = vmax.f32 %v1899_v63, %v1900_v14  ;;  %v1724_v37 = vcombine.low %v1486_v44, %v1488_v0  ;;  %v3963_v56 = vcombine.low %v3941_v10, %v3948_v54  ;;  %v3324_v19 = vcombine.high %v7084_v36, %v7084_v36 }
 0x1cb   : > { %v5648_v1 = vpop.f32.mrf.mxu0  ;;  %v4407_v59 = vmax.f32 %v4405_v13, %v4406_v16  ;;  %v3331_v52 = vrot.slane %v7084_v36, %v6125_v57  ;;  %v3964_v42 = vcombine.low %v3955_v55, %v3962_v24  ;;  %v1731_v8 = vrot.slane %v1723_v23, %v6140_v15 }
 0x1cc   : > { %v7135_v38 = vpop.f32.mrf.mxu1  ;;  %v1902_v22 = vrot.slane %v1901_v30, 1  ;;  %v1738_v40 = vrot.slane %v1724_v37, %v6140_v15  ;;  %v3971_v47 = vrot.slane %v3963_v56, %v6125_v57  ;;  %v3338_v53 = vrot.slane %v3324_v19, %v6125_v57 }
 0x1cd   : > { %v7139_v4 = vpop.f32.mrf.mxu0  ;;  %v4408_v61 = vrot.slane %v4407_v59, 2  ;;  %v3339_v6 = vcombine.high %v3331_v52, %v3331_v52  ;;  %v3978_v36 = vrot.slane %v3964_v42, %v6125_v57  ;;  %v3347_v49 = vrot.slane %v3331_v52, %v6125_v57 }
 0x1ce   : > { %v5691_v32 = vpop.f32.mrf.mxu1  ;;  %v7143_v18 = vmax.f32 %v1901_v30, %v1902_v22  ;;  %v7146_v60 = vcombine.low %v1731_v8, %v1738_v40  ;;  %v3340_v21 = vcombine.high %v3338_v53, %v3338_v53  ;;  %v3354_v20 = vrot.slane %v3338_v53, %v6125_v57 }
 0x1cf   : > { %v5651_v43 = vpop.f32.mrf.mxu0  ;;  %v7149_v34 = vmax.f32 %v4407_v59, %v4408_v61  ;;  %v3361_v9 = vrot.slane %v3339_v6, %v6125_v57  ;;  %v7155_v46 = vcombine.low %v3971_v47, %v3978_v36  ;;  %v3369_v11 = vcombine.high %v3347_v49, %v3347_v49 }
 0x1d0   : > { %v7153_v7 = vpop.f32.mrf.mxu1  ;;  %v3980_v48 = vcombine.low %v3323_v58, %v3347_v49  ;;  %v1489_v63 = vcombine.high %v7088_v62, %v7088_v62  ;;  %v3368_v35 = vrot.slane %v3340_v21, %v6125_v57  ;;  %v1496_v28 = vrot.slane %v7088_v62, %v6140_v15 }
 0x1d1   : > { %v7159_v29 = vpop.f32.mrf.mxu0  ;;  %v4410_v44 = vrot.slane %v7149_v34, 1  ;;  %v3371_v13 = vcombine.high %v3361_v9, %v3361_v9  ;;  %v3981_v10 = vcombine.low %v3361_v9, %v3369_v11  ;;  %v3373_v33 = vcombine.high %v7095_v31, %v7095_v31 }
 0x1d2   : > { %v5692_v39 = vpop.f32.mrf.mxu1  ;;  %v3988_v14 = vrot.slane %v3980_v48, %v6125_v57  ;;  %v1503_v25 = vrot.slane %v1489_v63, %v6140_v15  ;;  %v4019_v54 = vcombine.low %v3354_v20, %v3368_v35  ;;  %v5502_v24 = vcombine.high %v3354_v20, %v3368_v35 }
 0x1d3   : > { %v5652_v0 = vpop.f32.mrf.mxu0  ;;  %v4002_v16 = vrot.slane %v3371_v13, %v6125_v57  ;;  %v1504_v58 = vcombine.high %v1496_v28, %v1496_v28  ;;  %v3995_v30 = vrot.slane %v3981_v10, %v6125_v57  ;;  %v3380_v55 = vrot.slane %v7095_v31, %v6125_v57 }
 0x1d4   : > { %v7170_v27 = vpop.f32.mrf.mxu1  ;;  %v1754_v62 = vrot.slane %v1503_v25, %v6140_v15  ;;  %v3387_v23 = vrot.slane %v3373_v33, %v6125_v57  ;;  %v4029_v59 = vrot.slane %v4019_v54, %v6125_v57  ;;  %v4036_v56 = vrot.slane %v5502_v24, %v6125_v57 }
 0x1d5   : > { %v7177_v37 = vpop.f32.mrf.mxu0  ;;  %v4017_v1 = vrot.slane %v4002_v16, %v6125_v57  ;;  %v1740_v19 = vcombine.low %v1496_v28, %v1504_v58  ;;  %v4003_v22 = vcombine.low %v3988_v14, %v3995_v30  ;;  %v3388_v42 = vcombine.high %v3380_v55, %v3380_v55 }
 0x1d6   : > { %v5695_v52 = vpop.f32.mrf.mxu1  ;;  %v3389_v8 = vcombine.high %v3387_v23, %v3387_v23  ;;  %v3396_v40 = vrot.slane %v3380_v55, %v6125_v57  ;;  %v4051_v47 = vcombine.low %v4029_v59, %v4036_v56  ;;  %v3403_v53 = vrot.slane %v3387_v23, %v6125_v57 }
 0x1d7   : > { %v4844_v61 = vpop.f32.mrf.mxu0  ;;  %v1747_v31 = vrot.slane %v1740_v19, %v6140_v15  ;;  %v1505_v6 = vcombine.high %v1503_v25, %v1503_v25  ;;  %v4010_v36 = vrot.slane %v4003_v22, %v6125_v57  ;;  %v3410_v49 = vrot.slane %v3388_v42, %v6125_v57 }
 0x1d8   : > { %v3014_v32 = vpop.f32.mrf.mxu1  ;;  %v3417_v43 = vrot.slane %v3389_v8, %v6125_v57  ;;  %v1506_v21 = vcombine.high %v7101_v26, %v7101_v26  ;;  %v7193_v9 = vrot.slane %v4051_v47, %v6125_v57  ;;  %v1513_v48 = vrot.slane %v7101_v26, %v6140_v15 }
 0x1d9   : > { %v7190_v20 = vpop.f32.mrf.mxu0  ;;  %v1755_v11 = vcombine.low %v1747_v31, %v1754_v62  ;;  %v3422_v63 = vcombine.high %v7113_v5, %v7113_v5  ;;  %v4018_v13 = vcombine.low %v4010_v36, %v4017_v1  ;;  %v4021_v28 = vcombine.low %v3396_v40, %v3410_v49 }
 0x1da   : > { %v5696_v35 = vpop.f32.mrf.mxu1  ;;  %v5503_v39 = vcombine.high %v3396_v40, %v3410_v49  ;;  %v4068_v10 = vcombine.low %v3403_v53, %v3417_v43  ;;  %v5504_v33 = vcombine.high %v3403_v53, %v3417_v43  ;;  %v7201_v0 = vrot.slane %v1506_v21, %v6140_v15 }
 0x1db   : > { %v4847_v14 = vpop.f32.mrf.mxu0  ;;  %v1904_v25 = vsel %vm1871_vm4, %v1755_v11, -inf  ;;  %v1521_v16 = vcombine.high %v1513_v48, %v1513_v48  ;;  %v4412_v54 = vsel %vm4387_vm5, %v4018_v13, -inf  ;;  %v4043_v24 = vrot.slane %v4021_v28, %v6125_v57 }
 0x1dc   : > { %v1905_v26 = vmax.f32 %v7146_v60, %v1904_v25  ;;  %v4050_v58 = vrot.slane %v5503_v39, %v6125_v57  ;;  %v4413_v62 = vmax.f32 %v7155_v46, %v4412_v54  ;;  %v4076_v55 = vrot.slane %v4068_v10, %v6125_v57 }
 0x1dd   : > { %v7207_v30 = vpop.f32.mrf.mxu0  ;;  %v4083_v23 = vrot.slane %v5504_v33, %v6125_v57  ;;  %v1756_v1 = vcombine.low %v1505_v6, %v1513_v48  ;;  %v1757_v19 = vcombine.low %v1521_v16, %v7201_v0  ;;  %v3429_v60 = vrot.slane %v7113_v5, %v6125_v57 }
 0x1de   : > { %v1906_v59 = vrot.slane %v1905_v26, 4  ;;  %v4052_v56 = vcombine.low %v4043_v24, %v4050_v58  ;;  %v4414_v22 = vrot.slane %v4413_v62, 4  ;;  %v3436_v40 = vrot.slane %v3422_v63, %v6125_v57 }
 0x1df   : > { %v4852_v52 = vpop.f32.mrf.mxu0  ;;  %v4091_v42 = vcombine.low %v4076_v55, %v4083_v23  ;;  %v1764_v8 = vrot.slane %v1756_v1, %v6140_v15  ;;  %v1771_v47 = vrot.slane %v1757_v19, %v6140_v15  ;;  %v3437_v31 = vcombine.high %v3429_v60, %v3429_v60 }
 0x1e0   : > { %v1907_v46 = vmax.f32 %v1905_v26, %v1906_v59  ;;  %v4066_v61 = vrot.slane %v4052_v56, %v6125_v57  ;;  %v4415_v6 = vmax.f32 %v4413_v62, %v4414_v22  ;;  %v3438_v32 = vcombine.high %v3436_v40, %v3436_v40 }
 0x1e1   : > { %v7219_v53 = vpop.f32.mrf.mxu0  ;;  %v3445_v36 = vrot.slane %v3429_v60, %v6125_v57  ;;  %v3452_v5 = vrot.slane %v3436_v40, %v6125_v57  ;;  %v1772_v21 = vcombine.low %v1764_v8, %v1771_v47  ;;  %v3459_v11 = vrot.slane %v3437_v31, %v6125_v57 }
 0x1e2   : > { %v1908_v49 = vrot.slane %v1907_v46, 2  ;;  %v4067_v43 = vcombine.low %v7193_v9, %v4066_v61  ;;  %v4416_v63 = vrot.slane %v4415_v6, 2  ;;  %v3466_v35 = vrot.slane %v3438_v32, %v6125_v57 }
 0x1e3   : > { %v4855_v48 = vpop.f32.mrf.mxu0  ;;  %v3467_v13 = vcombine.high %v3445_v36, %v3445_v36  ;;  %v3468_v28 = vcombine.high %v3452_v5, %v3452_v5  ;;  %v3469_v10 = vcombine.high %v3459_v11, %v3459_v11  ;;  %v4090_v14 = vrot.slane %v3445_v36, %v6125_v57 }
 0x1e4   : > { %v1909_v39 = vmax.f32 %v1907_v46, %v1908_v49  ;;  %v4098_v25 = vrot.slane %v4091_v42, %v6125_v57  ;;  %v7230_v16 = vmax.f32 %v4415_v6, %v4416_v63  ;;  %v1522_v26 = vcombine.high %v7201_v0, %v7201_v0 }
 0x1e5   : > { %v7228_v33 = vpop.f32.mrf.mxu0  ;;  %v4107_v9 = vcombine.low %v3459_v11, %v3467_v13  ;;  %v4109_v54 = vcombine.low %v3466_v35, %v3468_v28  ;;  %v4105_v58 = vrot.slane %v4090_v14, %v6125_v57  ;;  %v4108_v62 = vcombine.low %v3469_v10, %v3452_v5 }
 0x1e6   : > { %v1910_v24 = vrot.slane %v1909_v39, 1  ;;  %v1523_v55 = vcombine.high %v7118_v12, %v7118_v12  ;;  %v1530_v59 = vrot.slane %v7118_v12, %v6140_v15  ;;  %v3470_v56 = vcombine.high %v3466_v35, %v3466_v35 }
 0x1e7   : > { %v4860_v23 = vpop.f32.mrf.mxu0  ;;  %v4117_v1 = vrot.slane %v4107_v9, %v6125_v57  ;;  %v3471_v19 = vcombine.high %v7124_v51, %v7124_v51  ;;  %v4106_v0 = vcombine.low %v4098_v25, %v4105_v58  ;;  %v4124_v52 = vrot.slane %v4108_v62, %v6125_v57 }
 0x1e8   : > { %v7242_v60 = vmax.f32 %v1909_v39, %v1910_v24  ;;  %v1537_v22 = vrot.slane %v1523_v55, %v6140_v15  ;;  %v1538_v8 = vcombine.high %v1530_v59, %v1530_v59  ;;  %v1773_v40 = vcombine.low %v1522_v26, %v1530_v59 }
 0x1e9   : > { %v7246_v42 = vpop.f32.mrf.mxu0  ;;  %v3478_v46 = vrot.slane %v7124_v51, %v6125_v57  ;;  %v3485_v12 = vrot.slane %v3471_v19, %v6125_v57  ;;  %v4139_v61 = vcombine.low %v4117_v1, %v4124_v52  ;;  %v4420_v47 = vsel %vm4387_vm5, %v4106_v0, -inf }
 0x1ea   : > { %v1539_v31 = vcombine.high %v1537_v22, %v1537_v22  ;;  %v4131_v6 = vrot.slane %v4109_v54, %v6125_v57  ;;  %v4421_v36 = vmax.f32 %v4067_v43, %v4420_v47  ;;  %v1780_v5 = vrot.slane %v1773_v40, %v6140_v15 }
 0x1eb   : > { %v4863_v32 = vpop.f32.mrf.mxu0  ;;  %v1787_v49 = vrot.slane %v1538_v8, %v6140_v15  ;;  %v3486_v11 = vcombine.high %v3478_v46, %v3478_v46  ;;  %v4147_v48 = vrot.slane %v4139_v61, %v6125_v57  ;;  %v3487_v51 = vcombine.high %v3485_v12, %v3485_v12 }
 0x1ec   : > { %v7256_v63 = vcombine.low %v1537_v22, %v1539_v31  ;;  %v3494_v35 = vrot.slane %v3478_v46, %v6125_v57  ;;  %v4422_v28 = vrot.slane %v4421_v36, 4  ;;  %v3501_v10 = vrot.slane %v3485_v12, %v6125_v57 }
 0x1ed   : > { %v7259_v13 = vpop.f32.mrf.mxu0  ;;  %v1788_v39 = vcombine.low %v1780_v5, %v1787_v49  ;;  %v3508_v43 = vrot.slane %v3486_v11, %v6125_v57  ;;  %v3515_v25 = vrot.slane %v3487_v51, %v6125_v57  ;;  %v1540_v55 = vcombine.high %v7126_v50, %v7126_v50 }
 0x1ee   : > { %v1797_v14 = vrot.slane %v7256_v63, %v6140_v15  ;;  %v3516_v9 = vcombine.high %v3494_v35, %v3494_v35  ;;  %v4110_v54 = vcombine.low %v3470_v56, %v3494_v35  ;;  %v4423_v24 = vmax.f32 %v4421_v36, %v4422_v28 }
 0x1ef   : > { %v4868_v26 = vpop.f32.mrf.mxu0  ;;  %v1912_v58 = vsel %vm1871_vm4, %v1788_v39, -inf  ;;  %v3518_v62 = vcombine.high %v3508_v43, %v3508_v43  ;;  %v4178_v19 = vrot.slane %v3515_v25, %v6125_v57  ;;  %v5505_v8 = vcombine.high %v3501_v10, %v3515_v25 }
 0x1f0   : > { %v1913_v23 = vmax.f32 %v1772_v21, %v1912_v58  ;;  %v4138_v1 = vrot.slane %v4110_v54, %v6125_v57  ;;  %v4156_v59 = vcombine.low %v3508_v43, %v3516_v9  ;;  %v4424_v52 = vrot.slane %v4423_v24, 2 }
 0x1f1   : > { %v7271_v0 = vpop.f32.mrf.mxu0  ;;  %v4157_v22 = vcombine.low %v3518_v62, %v3501_v10  ;;  %v1547_v56 = vrot.slane %v7126_v50, %v6140_v15  ;;  %v4193_v61 = vrot.slane %v4178_v19, %v6125_v57  ;;  %v4205_v32 = vrot.slane %v5505_v8, %v6125_v57 }
 0x1f2   : > { %v1914_v40 = vrot.slane %v1913_v23, 4  ;;  %v4140_v46 = vcombine.low %v4131_v6, %v4138_v1  ;;  %v4164_v12 = vrot.slane %v4156_v59, %v6125_v57  ;;  %v7277_v47 = vmax.f32 %v4423_v24, %v4424_v52 }
 0x1f3   : > { %v4871_v21 = vpop.f32.mrf.mxu0  ;;  %v4171_v31 = vrot.slane %v4157_v22, %v6125_v57  ;;  %v1554_v36 = vrot.slane %v1540_v55, %v6140_v15  ;;  %v1555_v11 = vcombine.high %v1547_v56, %v1547_v56  ;;  %v3520_v50 = vcombine.high %v7135_v38, %v7135_v38 }
 0x1f4   : > { %v1915_v5 = vmax.f32 %v1913_v23, %v1914_v40  ;;  %v4154_v49 = vrot.slane %v4140_v46, %v6125_v57  ;;  %v4426_v63 = vrot.slane %v7277_v47, 1  ;;  %v3527_v28 = vrot.slane %v7135_v38, %v6125_v57 }
 0x1f5   : > { %v7285_v6 = vpop.f32.mrf.mxu0  ;;  %v4179_v51 = vcombine.low %v4164_v12, %v4171_v31  ;;  %v1556_v35 = vcombine.high %v1554_v36, %v1554_v36  ;;  %v1790_v43 = vcombine.low %v1547_v56, %v1555_v11  ;;  %v3534_v25 = vrot.slane %v3520_v50, %v6125_v57 }
 0x1f6   : > { %v1916_v39 = vrot.slane %v1915_v5, 2  ;;  %v4155_v10 = vcombine.low %v4147_v48, %v4154_v49  ;;  %v3535_v24 = vcombine.high %v3527_v28, %v3527_v28  ;;  %v3543_v58 = vrot.slane %v3527_v28, %v6125_v57 }
 0x1f7   : > { %v4876_v9 = vpop.f32.mrf.mxu0  ;;  %v4186_v54 = vrot.slane %v4179_v51, %v6125_v57  ;;  %v1806_v26 = vcombine.low %v1554_v36, %v1556_v35  ;;  %v1804_v55 = vrot.slane %v1790_v43, %v6140_v15  ;;  %v3536_v23 = vcombine.high %v3534_v25, %v3534_v25 }
 0x1f8   : > { %v1917_v62 = vmax.f32 %v1915_v5, %v1916_v39  ;;  %v3550_v1 = vrot.slane %v3534_v25, %v6125_v57  ;;  %v3557_v48 = vrot.slane %v3535_v24, %v6125_v57  ;;  %v1557_v19 = vcombine.high %v7139_v4, %v7139_v4 }
 0x1f9   : > { %v7295_v59 = vpop.f32.mrf.mxu0  ;;  %v4194_v38 = vcombine.low %v4186_v54, %v4193_v61  ;;  %v1564_v52 = vrot.slane %v7139_v4, %v6140_v15  ;;  %v1805_v8 = vcombine.low %v1797_v14, %v1804_v55  ;;  %v3564_v56 = vrot.slane %v3536_v23, %v6125_v57 }
 0x1fa   : > { %v1918_v22 = vrot.slane %v1917_v62, 1  ;;  %v1813_v40 = vrot.slane %v1806_v26, %v6140_v15  ;;  %v4196_v21 = vcombine.low %v3543_v58, %v3557_v48  ;;  %v5506_v31 = vcombine.high %v3543_v58, %v3557_v48 }
 0x1fb   : > { %v4879_v46 = vpop.f32.mrf.mxu0  ;;  %v4428_v12 = vsel %vm4387_vm5, %v4194_v38, -inf  ;;  %v1571_v61 = vrot.slane %v1557_v19, %v6140_v15  ;;  %v4198_v49 = vcombine.low %v3550_v1, %v3564_v56  ;;  %v5507_v11 = vcombine.high %v3550_v1, %v3564_v56 }
 0x1fc   : > { %v7306_v36 = vmax.f32 %v1917_v62, %v1918_v22  ;;  %v4429_v5 = vmax.f32 %v4155_v10, %v4428_v12  ;;  %v4212_v4 = vrot.slane %v4196_v21, %v6125_v57  ;;  %v4219_v14 = vrot.slane %v5506_v31, %v6125_v57 }
 0x1fd   : > { %v7308_v50 = vpop.f32.mrf.mxu0  ;;  %v1572_v51 = vcombine.high %v1564_v52, %v1564_v52  ;;  %v1820_v35 = vrot.slane %v1564_v52, %v6140_v15  ;;  %v4226_v39 = vrot.slane %v4198_v49, %v6125_v57  ;;  %v4252_v43 = vrot.slane %v5507_v11, %v6125_v57 }
 0x1fe   : > { %v4430_v28 = vrot.slane %v4429_v5, 4  ;;  %v3569_v25 = vcombine.high %v7153_v7, %v7153_v7  ;;  %v4227_v9 = vcombine.low %v4205_v32, %v4212_v4  ;;  %v3576_v24 = vrot.slane %v7153_v7, %v6125_v57 }
 0x1ff   : > { %v4884_v10 = vpop.f32.mrf.mxu0  ;;  %v1821_v54 = vcombine.low %v1813_v40, %v1820_v35  ;;  %v1822_v26 = vcombine.low %v1572_v51, %v1571_v61  ;;  %v4228_v62 = vcombine.low %v4219_v14, %v4226_v39  ;;  %v1573_v23 = vcombine.high %v1571_v61, %v1571_v61 }
 0x200   : > { %v7319_v58 = vmax.f32 %v4429_v5, %v4430_v28  ;;  %v3583_v55 = vrot.slane %v3569_v25, %v6125_v57  ;;  %v7325_v38 = vrot.slane %v4227_v9, %v6125_v57  ;;  %v3584_v19 = vcombine.high %v3576_v24, %v3576_v24 }
 0x201   : > { %v7322_v1 = vpop.f32.mrf.mxu0  ;;  %v1830_v48 = vrot.slane %v1822_v26, %v6140_v15  ;;  %v1920_v32 = vsel %vm1871_vm4, %v1821_v54, -inf  ;;  %v4242_v52 = vrot.slane %v4228_v62, %v6125_v57  ;;  %v3592_v56 = vrot.slane %v3576_v24, %v6125_v57 }
 0x202   : > { %v1921_v22 = vmax.f32 %v1805_v8, %v1920_v32  ;;  %v3585_v7 = vcombine.high %v3583_v55, %v3583_v55  ;;  %v3599_v46 = vrot.slane %v3583_v55, %v6125_v57  ;;  %v3606_v12 = vrot.slane %v3584_v19, %v6125_v57 }
 0x203   : > { %v4887_v40 = vpop.f32.mrf.mxu0  ;;  %v1574_v21 = vcombine.high %v7159_v29, %v7159_v29  ;;  %v1581_v31 = vrot.slane %v7159_v29, %v6140_v15  ;;  %v4243_v61 = vcombine.low %v7325_v38, %v4242_v52  ;;  %v3614_v8 = vcombine.high %v3592_v56, %v3592_v56 }
 0x204   : > { %v1922_v5 = vrot.slane %v1921_v22, 4  ;;  %v3613_v49 = vrot.slane %v3585_v7, %v6125_v57  ;;  %v3615_v11 = vcombine.high %v3599_v46, %v3599_v46  ;;  %v3616_v4 = vcombine.high %v3606_v12, %v3606_v12 }
 0x205   : > { %v4245_v14 = vcombine.low %v3592_v56, %v3606_v12  ;;  %v1588_v51 = vrot.slane %v1574_v21, %v6140_v15  ;;  %v4266_v28 = vrot.slane %v3614_v8, %v6125_v57  ;;  %v1589_v39 = vcombine.high %v1581_v31, %v1581_v31 }
 0x206   : > { %v1923_v35 = vmax.f32 %v1921_v22, %v1922_v5  ;;  %v1823_v25 = vcombine.low %v1573_v23, %v1581_v31  ;;  %v4283_v29 = vcombine.low %v3616_v4, %v3599_v46  ;;  %v4284_v9 = vcombine.low %v3613_v49, %v3615_v11 }
 0x207   : > { %v4259_v10 = vrot.slane %v4245_v14, %v6125_v57  ;;  %v1590_v54 = vcombine.high %v1588_v51, %v1588_v51  ;;  %v4281_v24 = vrot.slane %v4266_v28, %v6125_v57  ;;  %v1839_v55 = vcombine.low %v1589_v39, %v1588_v51 }
 0x208   : > { %v1924_v26 = vrot.slane %v1923_v35, 2  ;;  %v1837_v62 = vrot.slane %v1823_v25, %v6140_v15  ;;  %v4293_v32 = vrot.slane %v4283_v29, %v6125_v57  ;;  %v4300_v19 = vrot.slane %v4284_v9, %v6125_v57 }
 0x209   : > { %v4267_v38 = vcombine.low %v4252_v43, %v4259_v10  ;;  %v1853_v52 = vrot.slane %v1590_v54, %v6140_v15  ;;  %v1846_v7 = vrot.slane %v1839_v55, %v6140_v15  ;;  %v3617_v56 = vcombine.high %v3613_v49, %v3613_v49 }
 0x20a   : > { %v1925_v23 = vmax.f32 %v1923_v35, %v1924_v26  ;;  %v1838_v22 = vcombine.low %v1830_v48, %v1837_v62  ;;  %v4315_v46 = vcombine.low %v4293_v32, %v4300_v19  ;;  %v3618_v12 = vcombine.high %v7170_v27, %v7170_v27 }
 0x20b   : > { %v4274_v40 = vrot.slane %v4267_v38, %v6125_v57  ;;  %v3625_v43 = vrot.slane %v7170_v27, %v6125_v57  ;;  %v1854_v31 = vcombine.low %v1846_v7, %v1853_v52  ;;  %v4901_v5 = vcombine.high %v7177_v37, %v7177_v37 }
 0x20c   : > { %v1926_v21 = vrot.slane %v1925_v23, 1  ;;  %v4902_v48 = vcombine.high %v7190_v20, %v7190_v20  ;;  %v4323_v15 = vrot.slane %v4315_v46, %v6125_v57  ;;  %v3632_v49 = vrot.slane %v3618_v12, %v6125_v57 }
 0x20d   : > { %v4282_v8 = vcombine.low %v4274_v40, %v4281_v24  ;;  %v3633_v11 = vcombine.high %v3625_v43, %v3625_v43  ;;  %v1928_v14 = vsel %vm1871_vm4, %v1854_v31, -inf  ;;  %v3641_v27 = vrot.slane %v3625_v43, %v6125_v57 }
 0x20e   : > { %v7359_v4 = vmax.f32 %v1925_v23, %v1926_v21  ;;  %v4917_v51 = vcombine.low %v7177_v37, %v4901_v5  ;;  %v1929_v28 = vmax.f32 %v1838_v22, %v1928_v14  ;;  %v3634_v39 = vcombine.high %v3632_v49, %v3632_v49 }
 0x20f   : > { %v4436_v35 = vsel %vm4387_vm5, %v4282_v8, -inf  ;;  %v3648_v25 = vrot.slane %v3632_v49, %v6125_v57  ;;  %v3655_v29 = vrot.slane %v3633_v11, %v6125_v57  ;;  %v3663_v9 = vcombine.high %v3641_v27, %v3641_v27 }
 0x210   : > { %v7366_v10 = vmax.f32 %v4243_v61, %v4436_v35  ;;  %v4285_v54 = vcombine.low %v3617_v56, %v3641_v27  ;;  %v1930_v26 = vrot.slane %v1929_v28, 4  ;;  %v3662_v24 = vrot.slane %v3634_v39, %v6125_v57 }
 0x211   : > { %v3664_v62 = vcombine.high %v3648_v25, %v3648_v25  ;;  %v4934_v37 = vsel %vm4933_vm7, %v7190_v20, -inf  ;;  %v3665_v38 = vcombine.high %v3655_v29, %v3655_v29  ;;  %v4286_v32 = vcombine.low %v3655_v29, %v3663_v9 }
 0x212   : > { %v4438_v55 = vrot.slane %v7366_v10, 4  ;;  %v4307_v19 = vrot.slane %v4285_v54, %v6125_v57  ;;  %v1931_v61 = vmax.f32 %v1929_v28, %v1930_v26  ;;  %v3666_v52 = vcombine.high %v3662_v24, %v3662_v24 }
 0x213   : > { %v4333_v23 = vcombine.low %v3662_v24, %v3664_v62  ;;  %v4935_v22 = vmax.f32 %v4917_v51, %v4934_v37  ;;  %v4314_v7 = vrot.slane %v4286_v32, %v6125_v57  ;;  %v4332_v56 = vcombine.low %v3665_v38, %v3648_v25 }
 0x214   : > { %v4903_v40 = vcombine.high %v7207_v30, %v7207_v30  ;;  %v4918_v46 = vcombine.low %v4902_v48, %v7207_v30  ;;  %v1932_v20 = vrot.slane %v1931_v61, 2  ;;  %v4354_v43 = vrot.slane %v3666_v52, %v6125_v57 }
 0x215   : > { %v4347_v12 = vrot.slane %v4333_v23, %v6125_v57  ;;  %v4936_v21 = vrot.slane %v4935_v22, 4  ;;  %v4316_v31 = vcombine.low %v4307_v19, %v4314_v7  ;;  %v4340_v5 = vrot.slane %v4332_v56, %v6125_v57 }
 0x216   : > { %v4942_v8 = vsel %vm4933_vm7, %v4903_v40, -inf  ;;  %v7385_v49 = vsel %vm5006_vm6, %v7109_v2, %v7054_v41  ;;  %v1933_v11 = vmax.f32 %v1931_v61, %v1932_v20  ;;  %v4369_v14 = vrot.slane %v4354_v43, %v6125_v57 }
 0x217   : > { %v4937_v30 = vmax.f32 %v4935_v22, %v4936_v21  ;;  %v4943_v48 = vmax.f32 %v4918_v46, %v4942_v8  ;;  %v4330_v27 = vrot.slane %v4316_v31, %v6125_v57  ;;  %v4355_v51 = vcombine.low %v4340_v5, %v4347_v12 }
 0x218   : > { %v4904_v35 = vcombine.high %v7219_v53, %v7219_v53  ;;  %v4905_v28 = vcombine.high %v7228_v33, %v7228_v33  ;;  %v1934_v39 = vrot.slane %v1933_v11, 1  ;;  %v4950_v41 = vsel %vm4933_vm7, %v7228_v33, -inf }
 0x219   : > { %v4938_v25 = vrot.slane %v4937_v30, 2  ;;  %v4944_v29 = vrot.slane %v4943_v48, 4  ;;  %v4331_v2 = vcombine.low %v4323_v15, %v4330_v27  ;;  %v4362_v9 = vrot.slane %v4355_v51, %v6125_v57 }
 0x21a   : > { %v4919_v54 = vcombine.low %v7219_v53, %v4904_v35  ;;  %v5009_v26 = vsel %vm5008_vm8, %v7097_v17, %v7059_v3  ;;  %v4906_v37 = vcombine.high %v7246_v42, %v7246_v42  ;;  %v4920_v38 = vcombine.low %v4905_v28, %v7246_v42 }
 0x21b   : > { %v4939_v24 = vmax.f32 %v4937_v30, %v4938_v25  ;;  %v4945_v62 = vmax.f32 %v4943_v48, %v4944_v29  ;;  %v4370_v32 = vcombine.low %v4362_v9, %v4369_v14  ;;  %v5011_v33 = vsel %vm5010_vm9, %v7143_v18, %v5009_v26 }
 0x21c   : > { %v4951_v19 = vmax.f32 %v4919_v54, %v4950_v41  ;;  %v4907_v57 = vcombine.high %v7259_v13, %v7259_v13  ;;  %v4958_v61 = vsel %vm4933_vm7, %v4906_v37, -inf  ;;  %v4908_v3 = vcombine.high %v7271_v0, %v7271_v0 }
 0x21d   : > { %v4940_v53 = vrot.slane %v4939_v24, 1  ;;  %v4946_v15 = vrot.slane %v4945_v62, 2  ;;  %v4444_v17 = vsel %vm4387_vm5, %v4370_v32, -inf  ;;  %v4959_v42 = vmax.f32 %v4920_v38, %v4958_v61 }
 0x21e   : > { %v4952_v52 = vrot.slane %v4951_v19, 4  ;;  %v4921_v23 = vcombine.low %v7259_v13, %v4907_v57  ;;  %v4445_v22 = vmax.f32 %v4331_v2, %v4444_v17  ;;  %v4966_v56 = vsel %vm4933_vm7, %v7271_v0, -inf }
 0x21f   : > { %v4941_v7 = vmax.f32 %v4939_v24, %v4940_v53  ;;  %v4947_v18 = vmax.f32 %v4945_v62, %v4946_v15  ;;  %v4960_v46 = vrot.slane %v4959_v42, 4  ;;  %v4909_v12 = vcombine.high %v7285_v6, %v7285_v6 }
 0x220   : > { %v4953_v40 = vmax.f32 %v4951_v19, %v4952_v52  ;;  %v4967_v20 = vmax.f32 %v4921_v23, %v4966_v56  ;;  %v4922_v21 = vcombine.low %v4908_v3, %v7285_v6  ;;  %v4910_v31 = vcombine.high %v7295_v59, %v7295_v59  ;;  %v7644_v56 = vld [vmem:[#allocation11_spill] sm:$0xff] }
 0x221   : > { %v4948_v43 = vrot.slane %v4947_v18, 1  ;;  %v1935_v13 = vmax.f32 %v1933_v11, %v1934_v39  ;;  %v4961_v8 = vmax.f32 %v4959_v42, %v4960_v46  ;;  %v4974_v0 = vsel %vm4933_vm7, %v4909_v12, -inf }
 0x222   : > { %v4954_v5 = vrot.slane %v4953_v40, 2  ;;  %v4968_v14 = vrot.slane %v4967_v20, 4  ;;  %v4975_v48 = vmax.f32 %v4922_v21, %v4974_v0  ;;  %v4923_v27 = vcombine.low %v7295_v59, %v4910_v31 }
 0x223   : > { %v4949_v30 = vmax.f32 %v4947_v18, %v4948_v43  ;;  %v4411_v51 = vmax.f32 %v7149_v34, %v4410_v44  ;;  %v4962_v6 = vrot.slane %v4961_v8, 2  ;;  %v4418_v25 = vrot.slane %v7230_v16, 1 }
 0x224   : > { %v4955_v35 = vmax.f32 %v4953_v40, %v4954_v5  ;;  %v4969_v28 = vmax.f32 %v4967_v20, %v4968_v14  ;;  %v4976_v39 = vrot.slane %v4975_v48, 4  ;;  %v4427_v29 = vmax.f32 %v7277_v47, %v4426_v63 }
 0x225   : > { %v5045_v11 = vsel %vm5006_vm6, %v4949_v30, %v4941_v7  ;;  %v4432_v41 = vrot.slane %v7319_v58, 2  ;;  %v4963_v59 = vmax.f32 %v4961_v8, %v4962_v6  ;;  %v4419_v54 = vmax.f32 %v7230_v16, %v4418_v25 }
 0x226   : > { %v4956_v2 = vrot.slane %v4955_v35, 1  ;;  %v4970_v9 = vrot.slane %v4969_v28, 2  ;;  %v4977_v34 = vmax.f32 %v4975_v48, %v4976_v39  ;;  %v4439_v26 = vmax.f32 %v7366_v10, %v4438_v55 }
 0x227   : > { %v4433_v44 = vmax.f32 %v7319_v58, %v4432_v41  ;;  %v4446_v24 = vrot.slane %v4445_v22, 4  ;;  %v4964_v37 = vrot.slane %v4963_v59, 1  ;;  %v5013_v47 = vsel %vm5012_vm10, %v7242_v60, %v5011_v33 }
 0x228   : > { %v4957_v62 = vmax.f32 %v4955_v35, %v4956_v2  ;;  %v4971_v38 = vmax.f32 %v4969_v28, %v4970_v9  ;;  %v4978_v63 = vrot.slane %v4977_v34, 2  ;;  %v4440_v19 = vrot.slane %v4439_v26, 2 }
 0x229   : > { %v4434_v32 = vrot.slane %v4433_v44, 1  ;;  %v4447_v57 = vmax.f32 %v4445_v22, %v4446_v24  ;;  %v4965_v53 = vmax.f32 %v4963_v59, %v4964_v37  ;;  %v5015_v58 = vsel %vm5014_vm11, %v7306_v36, %v5013_v47  ;;  %v7447_v36 = vld [vmem:[%s7554_s4] sm:$0x7]  ;;  %v5805_v37 = vld [vmem:[%s7555_s5 + $0xb0] sm:$0xff]  }
 0x22a   : > { %v5046_v16 = vsel %vm5008_vm8, %v4957_v62, %v5045_v11  ;;  %v4972_v15 = vrot.slane %v4971_v38, 1  ;;  %v4979_v61 = vmax.f32 %v4977_v34, %v4978_v63  ;;  %v4441_v55 = vmax.f32 %v4439_v26, %v4440_v19 }
 0x22b   : > { %v4435_v10 = vmax.f32 %v4433_v44, %v4434_v32  ;;  %v4448_v3 = vrot.slane %v4447_v57, 2  ;;  %v5047_v17 = vsel %vm5010_vm9, %v4965_v53, %v5046_v16  ;;  %v5017_v60 = vsel %vm5016_vm12, %v7359_v4, %v5015_v58  ;;  %v5806_v32 = vld [vmem:[%s7555_s5 + $0xa8] sm:$0xff]   ;;  %v5807_v16 = vld [vmem:[%s7555_s5 + $0xa0] sm:$0xff]   ;;  %v5808_v53 = vld [vmem:[%s7555_s5 + $0x98] sm:$0xff]  }
 0x22c   : > { %v4973_v52 = vmax.f32 %v4971_v38, %v4972_v15  ;;  %v4980_v33 = vrot.slane %v4979_v61, 1  ;;  %v4442_v42 = vrot.slane %v4441_v55, 1  ;;  %v5019_v22 = vsel %vm5018_vm13, %v1935_v13, %v5017_v60  ;;  %v5809_v58 = vld [vmem:[%s7555_s5 + $0x90] sm:$0xff]  }
 0x22d   : > { %v4449_v23 = vmax.f32 %v4447_v57, %v4448_v3  ;;  %v5030_v18 = vsel %vm5008_vm8, %v4411_v51, %v7385_v49  ;;  %v5057_v40 = vsub.s32 0, %v7644_v56  ;;  %v5061_v4 = vsub.s32 1, %v7644_v56  ;;  %v5811_v3 = vld [vmem:[%s7555_s5 + $0x80] sm:$0xff]  }
 0x22e   : > { %v5048_v7 = vsel %vm5012_vm10, %v4973_v52, %v5047_v17  ;;  %v4981_v46 = vmax.f32 %v4979_v61, %v4980_v33  ;;  %v4443_v20 = vmax.f32 %v4441_v55, %v4442_v42  ;;  %v5031_v43 = vsel %vm5010_vm9, %v4419_v54, %v5030_v18 }
 0x22f   : > { %v4450_v12 = vrot.slane %v4449_v23, 1  ;;  %v5032_v21 = vsel %vm5012_vm10, %v4427_v29, %v5031_v43  ;;  %v5058_v31 = vrot.slane %v7447_v36, %v5057_v40  ;;  %v5062_v13 = vrot.slane %v7447_v36, %v5061_v4 }
 0x230   : > { %v4911_v5 = vcombine.high %v7308_v50, %v7308_v50  ;;  %v5033_v49 = vsel %vm5014_vm11, %v4435_v10, %v5032_v21  ;;  %v4982_v14 = vsel %vm4933_vm7, %v7308_v50, -inf  ;;  %v4912_v0 = vcombine.high %v7322_v1, %v7322_v1  ;;  %v5810_v10 = vld [vmem:[%s7555_s5 + $0x88] sm:$0xff]  }
 0x231   : > { %v4451_v8 = vmax.f32 %v4449_v23, %v4450_v12  ;;  %v5034_v30 = vsel %vm5016_vm12, %v4443_v20, %v5033_v49  ;;  %v5070_v48 = vadd.f32 %v5058_v31, %v5019_v22  ;;  %v4983_v51 = vmax.f32 %v4923_v27, %v4982_v14  ;;  %v5804_v27 = vld [vmem:[%s7555_s5 + $0xb8] sm:$0xff]  }
 0x232   : > { %v4924_v35 = vcombine.low %v4911_v5, %v7322_v1  ;;  %v4990_v28 = vsel %vm4933_vm7, %v4912_v0, -inf  ;;  %v5049_v25 = vsel %vm5014_vm11, %v4981_v46, %v5048_v7  ;;  %v5065_v15 = vsub.s32 2, %v7644_v56 }
 0x233   : > { %v5035_v6 = vsel %vm5018_vm13, %v4451_v8, %v5034_v30  ;;  %v4984_v39 = vrot.slane %v4983_v51, 4  ;;  %v5073_v41 = vmax.f32 %v5070_v48, 0.0 }
 0x234   : > { %v5071_v11 = vadd.f32 %v5062_v13, %v5035_v6  ;;  %v4991_v29 = vmax.f32 %v4924_v35, %v4990_v28  ;;  %v5066_v61 = vrot.slane %v7447_v36, %v5065_v15  ;;  %v5524_v36 = vld [vmem:[%s7556_s6] ss:$0 sm:$0xff] }
 0x235   : > { %v4985_v2 = vmax.f32 %v4983_v51, %v4984_v39  ;;  %v5076_v34 = vpack.c.bf16 %v5073_v41, %v5073_v41 }
 0x236   : > { %v5074_v50 = vmax.f32 %v5071_v11, 0.0  ;;  %v4992_v59 = vrot.slane %v4991_v29, 4 }
 0x237   : > { %v4986_v54 = vrot.slane %v4985_v2, 2 }
 0x238   : > { %v5077_v9 = vpack.c.bf16 %v5074_v50, %v5074_v50  ;;  %v4993_v1 = vmax.f32 %v4991_v29, %v4992_v59 }
 0x239   : > { %v4987_v44 = vmax.f32 %v4985_v2, %v4986_v54 }
 0x23a   : > { %5310 = vmatprep.mubr.bf16.mxu1 %v5077_v9  ;;  %v4994_v26 = vrot.slane %v4993_v1, 2 }
 0x23b   : > { %5311 = vmatmul.mubr.bf16.vlgmr.msra.gmra.mxu1 %v5076_v34  ;;  %v4988_v24 = vrot.slane %v4987_v44, 1 }
 0x23c   : > { %5698 = vmatpush3.bf16.msra.mxu1 %v5804_v27  ;;  %v4995_v62 = vmax.f32 %v4993_v1, %v4994_v26  ;;  %5713 = vmatprep.mubr.msk.bf16.mxu1 %vm5880_vm0, %v7597_v45 }
 0x23d   : > { %5699 = vmatprep.subr.bf16.mxu1 %v7597_v45  ;;  %v4989_v38 = vmax.f32 %v4987_v44, %v4988_v24 }
 0x23e   : > { %v4996_v47 = vrot.slane %v4995_v62, 1 }
 0x23f   : > { %v5050_v19 = vsel %vm5016_vm12, %v4989_v38, %v5049_v25 }
 0x240   : > { %v4997_v63 = vmax.f32 %v4995_v62, %v4996_v47  ;;  %5700 = vmatpush3.bf16.msra.mxu1 %v5805_v37 }
 0x241   : > { %5701 = vmatprep.subr.bf16.mxu1 %v7597_v45 }
 0x242   : > { %v5051_v57 = vsel %vm5018_vm13, %v4997_v63, %v5050_v19 }
 0x243   : > { %v5072_v55 = vadd.f32 %v5066_v61, %v5051_v57 }
 0x244   : > { %5702 = vmatpush3.bf16.msra.mxu1 %v5806_v32 }
 0x245   : > { %5703 = vmatprep.subr.bf16.mxu1 %v7597_v45  ;;  %v5075_v17 = vmax.f32 %v5072_v55, 0.0 }
 0x247   : > { %v5078_v52 = vpack.c.bf16 %v5075_v17, %v5075_v17 }
 0x248   : > { %5704 = vmatpush3.bf16.msra.mxu1 %v5807_v16 }
 0x249   : > { %5705 = vmatprep.subr.bf16.mxu1 %v7597_v45 }
 0x24c   : > { %5706 = vmatpush3.bf16.msra.mxu1 %v5808_v53 }
 0x24d   : > { %5707 = vmatprep.subr.bf16.mxu1 %v7597_v45 }
 0x250   : > { %5708 = vmatpush3.bf16.msra.mxu1 %v5809_v58 }
 0x251   : > { %5709 = vmatprep.subr.bf16.mxu1 %v7597_v45 }
 0x254   : > { %5710 = vmatpush3.bf16.msra.mxu1 %v5810_v10 }
 0x255   : > { %5711 = vmatprep.subr.bf16.mxu1 %v7597_v45 }
 0x258   : > { %5712 = vmatpush3.bf16.msra.mxu1 %v5811_v3 }
 0x25b   : > { %5714 = vmatmul.mubr.bf16.vlgmr.msra.gmra.mxu1 %v5078_v52 }
 0x2fb   : > { %v5598_v60 = vpop.f32.mrf.mxu1 }
 0x2fd   : > { %v5599_v33 = vpop.f32.mrf.mxu1 }
 0x2fe   : > { %v5600_v22 = vadd.f32 %v5599_v33, %v5598_v60 }
 0x2ff   : > { %v5601_v42 = vpop.f32.mrf.mxu1 }
 0x300   : > { %v5313_v7 = vadd.f32 %v5600_v22, %v5524_v36 }
 0x301   : > { %v5602_v23 = vpop.f32.mrf.mxu1 }
 0x31b   : > { %v5352_v18 = vpop.f32.mrf.mxu1 }
 0x31c   : > { %v5353_v56 = vadd.f32 %v5352_v18, %v5313_v7 }
 0x31d   : > { %v5715_v40 = vpop.f32.mrf.mxu1 }
 0x31e   : > { %5812 = vtanh.f32 %v5353_v56 }
 0x31f   : > { %v5355_v45 = vpop.f32.mrf.mxu1 }
 0x321   : > { %v5716_v4 = vpop.f32.mrf.mxu1 }
 0x32b   : > { %v5813_v46 = vpop.eup %5812 }
 0x32c   : > { %5359 = vst [vmem:[%s274_s13] sm:$0xff] %v5813_v46 }
 0x32d   : > { %5827 = shalt.err (!%p5824_p3)
}
 0x32e   : > { %s5828_s9 = scalar_lea.hbm %s7515_s18, 128  ;;  %s5832_s29 = scalar_lea.hbm %s7557_s7, 1024 }
 0x32f   : > { %p5829_p4 = scmp.ne.s32.totalorder %s7515_s18, %s5828_s9  ;;  %p5833_p9 = scmp.lt.s32.totalorder %s7515_s18, %s7557_s7 }
 0x330   : > { %p5834_p10 = scmp.lt.s32.totalorder %s5832_s29, %s5828_s9 }
 0x331   : > { %p5830_p7 = pnand %p5829_p4, %p5963_p5 }
 0x332   : > { %p5835_p11 = por %p5834_p10, %p5833_p9 }
 0x333   : > { %p5831_p8 = pneg %p5830_p7 }
 0x335   : > { %p5836_p12 = pnand %p5835_p11, %p5831_p8 }
 0x337   : > { %5839 = shalt.err (!%p5836_p12)
}
 0x338   : > { %5717 = dma.vmem_to_hbm [thread:$0]  (%p5963_p5), %s5375_s14, 128, %s7515_s18, %s5361_s19  }
 0x339 PF: > { %p5723_p13 = scmp.ge.s32.totalorder %s5874_s27, 2  ;;  %s5386_s15 = sand.u32 1, %s5862_s24  }
 0x33a   : > { %s5387_s16 = scalar_lea.sflag [#allocation3], %s5386_s15 }
 0x33b   : > { %p5720_p0 = pnand %p5723_p13, %p5967_p6 }
 0x33d   : > { %p5721_p1 = pneg %p5720_p0 }
 0x33f   : > { %5857 = dma.done.wait (%p5721_p1), %s5387_s16, 128  }
 0x340   : > { %5859 = vsyncadd (%p5721_p1), %s5387_s16, 4294967168  ;;  %p17_p2 = scmp.ge.s32.totalorder %s5950_s30, 10   ;;  %s7645_s24 = smov %s5866_s25 }
 0x341   : > { %s7646_s25 = smov %s5870_s26  ;;  %s7647_s26 = smov %s5961_s10 }
 0x342   : > { %s7648_s27 = smov %s5950_s30  ;;  %19 = sbr.rel (!%p17_p2) target bundleno = 3 (0x3), region = 83 }
 0x347   :  { %5392 = vsyncpa [#allocation3], 1 }
 0x348   :  { %5394 = vsyncpa [#allocation3 + $0x1], 1 }

</bundles_post_ra>
